<compile_context>
chip_gen: v7x
topology: tpu7x:2x2x1
jax: 0.10.0
libtpu: 0.0.40
codegen_flags: <defaults>
</compile_context>

<pallas_src>
import functools
import math

import jax
import jax.numpy as jnp
from jax.experimental import pallas as pl
from jax.experimental.pallas import tpu as pltpu


# ----------------------------------------------------------------------------
# Generation-aware VMEM limit (v5e/v6e: 128 MiB physical -> 64 MiB scoped,
# v7x: 64 MiB physical -> 32 MiB scoped).
# ----------------------------------------------------------------------------
@functools.lru_cache(maxsize=None)
def _vmem_limit():
    try:
        cap = pltpu.get_tpu_info().vmem_capacity_bytes
        return int(min(cap // 2, 64 * 1024 * 1024))
    except Exception:
        return 32 * 1024 * 1024


# ----------------------------------------------------------------------------
# Tile-size helpers
# ----------------------------------------------------------------------------
def _tile_out(dim, pref):
    # Output/row dims: partial trailing blocks are safe (stores are masked).
    return dim if dim <= pref else pref


def _tile_div(dim, prefs=(512, 256, 128)):
    # Dims that must be exactly covered (contraction / streamed KV): pick a
    # divisor from prefs, else fall back to the full dim.
    if dim <= prefs[0]:
        return dim
    for p in prefs:
        if dim % p == 0:
            return p
    return dim


# ----------------------------------------------------------------------------
# LayerNorm kernel: a*(x-mean)/(std+eps)+b with unbiased std, eps=1e-6
# (exactly the module's custom LayerNorm, not torch.nn.LayerNorm).
# Emits bf16: its only consumers are matmuls that cast to bf16 anyway.
# ----------------------------------------------------------------------------
def _layernorm_kernel(x_ref, a_ref, b_ref, o_ref, *, eps):
    x = x_ref[...]                                   # (tm, D) f32
    d = x.shape[-1]
    mean = jnp.mean(x, axis=-1, keepdims=True)
    diff = x - mean
    var = jnp.sum(diff * diff, axis=-1, keepdims=True) * (1.0 / (d - 1))
    std = jnp.sqrt(var)
    inv = pl.reciprocal(std + eps, approx=True)      # EUP, off the VPU path
    o_ref[...] = (a_ref[...] * diff * inv + b_ref[...]).astype(o_ref.dtype)


def layernorm(x2d, a, b, eps=1e-6, out_dtype=jnp.bfloat16):
    M, D = x2d.shape
    tm = _tile_out(M, 1024)
    return pl.pallas_call(
        functools.partial(_layernorm_kernel, eps=eps),
        out_shape=jax.ShapeDtypeStruct((M, D), out_dtype),
        grid=(pl.cdiv(M, tm),),
        in_specs=[
            pl.BlockSpec((tm, D), lambda i: (i, 0)),
            pl.BlockSpec((1, D), lambda i: (0, 0)),
            pl.BlockSpec((1, D), lambda i: (0, 0)),
        ],
        out_specs=pl.BlockSpec((tm, D), lambda i: (i, 0)),
        compiler_params=pltpu.CompilerParams(
            dimension_semantics=("parallel",),
            vmem_limit_bytes=_vmem_limit()),
    )(x2d, a.reshape(1, D), b.reshape(1, D))


# ----------------------------------------------------------------------------
# Tiled linear kernel: y = x @ w + b [+ residual], bf16 MXU, f32 accumulation.
# ----------------------------------------------------------------------------
def _linear_kernel(*refs, has_residual):
    if has_residual:
        x_ref, w_ref, b_ref, r_ref, o_ref, acc_ref = refs
    else:
        x_ref, w_ref, b_ref, o_ref, acc_ref = refs
        r_ref = None
    k = pl.program_id(2)

    @pl.when(k == 0)
    def _():
        acc_ref[...] = jnp.zeros_like(acc_ref)

    acc_ref[...] += jnp.dot(
        x_ref[...].astype(jnp.bfloat16), w_ref[...],
        preferred_element_type=jnp.float32)

    @pl.when(k == pl.num_programs(2) - 1)
    def _():
        y = acc_ref[...] + b_ref[...]
        if has_residual:
            y = y + r_ref[...]
        o_ref[...] = y.astype(o_ref.dtype)


def linear(x2d, w, b, *, residual=None, out_dtype=jnp.float32):
    """x2d: (M, K) f32/bf16; w: (K, N) bf16 (pre-packed); b: (N,) f32."""
    M, K = x2d.shape
    N = w.shape[1]
    tm = _tile_out(M, 512)
    tn = _tile_out(N, 512)
    tk = _tile_div(K, prefs=(256, 512, 128))
    grid = (pl.cdiv(M, tm), pl.cdiv(N, tn), K // tk)

    in_specs = [
        pl.BlockSpec((tm, tk), lambda i, j, k: (i, k)),
        pl.BlockSpec((tk, tn), lambda i, j, k: (k, j)),
        pl.BlockSpec((1, tn), lambda i, j, k: (0, j)),
    ]
    args = [x2d, w, b.reshape(1, N)]
    has_residual = residual is not None
    if has_residual:
        in_specs.append(pl.BlockSpec((tm, tn), lambda i, j, k: (i, j)))
        args.append(residual)

    return pl.pallas_call(
        functools.partial(_linear_kernel, has_residual=has_residual),
        out_shape=jax.ShapeDtypeStruct((M, N), out_dtype),
        grid=grid,
        in_specs=in_specs,
        out_specs=pl.BlockSpec((tm, tn), lambda i, j, k: (i, j)),
        scratch_shapes=[pltpu.VMEM((tm, tn), jnp.float32)],
        compiler_params=pltpu.CompilerParams(
            dimension_semantics=("parallel", "parallel", "arbitrary"),
            vmem_limit_bytes=_vmem_limit()),
    )(*args)


# ----------------------------------------------------------------------------
# Fused FFN kernel: out = gelu(x @ w1 + b1) @ w2 + b2 + residual.
# Grid (M/tm, d_ff/tf); the (tm, tf) intermediate stays in VMEM/registers.
# ----------------------------------------------------------------------------
def _ffn_kernel(x_ref, w1_ref, b1_ref, w2_ref, b2_ref, r_ref, o_ref, acc_ref):
    j = pl.program_id(1)

    @pl.when(j == 0)
    def _():
        acc_ref[...] = jnp.zeros_like(acc_ref)

    h = jnp.dot(x_ref[...].astype(jnp.bfloat16), w1_ref[...],
                preferred_element_type=jnp.float32) + b1_ref[...]
    # exact (erf-based) GELU, matching nn.GELU() default
    h = 0.5 * h * (1.0 + jax.lax.erf(h * (1.0 / math.sqrt(2.0))))
    acc_ref[...] += jnp.dot(h.astype(jnp.bfloat16), w2_ref[...],
                            preferred_element_type=jnp.float32)

    @pl.when(j == pl.num_programs(1) - 1)
    def _():
        o_ref[...] = (acc_ref[...] + b2_ref[...] + r_ref[...]).astype(o_ref.dtype)


def ffn(x2d, w1, b1, w2, b2, *, residual, out_dtype=jnp.float32):
    M, D = x2d.shape
    F = w1.shape[1]
    tm = _tile_out(M, 512)
    tf = _tile_div(F)
    grid = (pl.cdiv(M, tm), F // tf)
    return pl.pallas_call(
        _ffn_kernel,
        out_shape=jax.ShapeDtypeStruct((M, D), out_dtype),
        grid=grid,
        in_specs=[
            pl.BlockSpec((tm, D), lambda i, j: (i, 0)),
            pl.BlockSpec((D, tf), lambda i, j: (0, j)),
            pl.BlockSpec((1, tf), lambda i, j: (0, j)),
            pl.BlockSpec((tf, D), lambda i, j: (j, 0)),
            pl.BlockSpec((1, D), lambda i, j: (0, 0)),
            pl.BlockSpec((tm, D), lambda i, j: (i, 0)),
        ],
        out_specs=pl.BlockSpec((tm, D), lambda i, j: (i, 0)),
        scratch_shapes=[pltpu.VMEM((tm, D), jnp.float32)],
        compiler_params=pltpu.CompilerParams(
            dimension_semantics=("parallel", "arbitrary"),
            vmem_limit_bytes=_vmem_limit()),
    )(x2d, w1, b1.reshape(1, F), w2, b2.reshape(1, D), residual)


# ----------------------------------------------------------------------------
# Flash-style attention: grid (B, q_tiles, kv_tiles), online softmax with
# per-head (m, l, acc) state in VMEM scratch.  q: (B,S,D), kv: (B,S,2D) bf16,
# keep: (B,1,S) f32 (1=keep, 0=pad, per key position).  Output (B,S,D) bf16,
# written lane-dense (no head transpose afterwards).
# ----------------------------------------------------------------------------
def _flash_attn_kernel(q_ref, kv_ref, keep_ref, o_ref, m_sc, l_sc, acc_sc,
                       *, n_heads, d_k, scale):
    ki = pl.program_id(2)

    @pl.when(ki == 0)
    def _():
        m_sc[...] = jnp.full_like(m_sc, -jnp.inf)
        l_sc[...] = jnp.zeros_like(l_sc)
        acc_sc[...] = jnp.zeros_like(acc_sc)

    q = q_ref[0]                         # (tq, D)   bf16
    kv = kv_ref[0]                       # (tkv, 2D) bf16
    keep = keep_ref[0]                   # (1, tkv)  f32
    D = n_heads * d_k
    neg = jnp.float32(-1e9)

    # TODO(synk): pair heads into 128-wide MXU tiles (d_k=64) if profiling
    # shows the score matmul is MXU-underfill-bound after the memory fixes.
    for h in range(n_heads):
        q_h = q[:, h * d_k:(h + 1) * d_k]
        k_h = kv[:, h * d_k:(h + 1) * d_k]
        v_h = kv[:, D + h * d_k:D + (h + 1) * d_k]
        s = jax.lax.dot_general(q_h, k_h, (((1,), (1,)), ((), ())),
                                preferred_element_type=jnp.float32) * scale
        s = jnp.where(keep == 0.0, neg, s)                    # (tq, tkv)
        m_prev = m_sc[h]                                      # (tq, 1)
        m_new = jnp.maximum(m_prev, jnp.max(s, axis=-1, keepdims=True))
        alpha = jnp.exp(m_prev - m_new)
        p = jnp.exp(s - m_new)
        l_sc[h] = alpha * l_sc[h] + jnp.sum(p, axis=-1, keepdims=True)
        acc_sc[h] = alpha * acc_sc[h] + jnp.dot(
            p.astype(jnp.bfloat16), v_h, preferred_element_type=jnp.float32)
        m_sc[h] = m_new

    @pl.when(ki == pl.num_programs(2) - 1)
    def _():
        for h in range(n_heads):
            out = acc_sc[h] * pl.reciprocal(l_sc[h], approx=True)
            o_ref[0, :, h * d_k:(h + 1) * d_k] = out.astype(o_ref.dtype)


def flash_attention(q, kv, keep, n_heads):
    B, S, D = q.shape
    d_k = D // n_heads
    scale = 1.0 / math.sqrt(d_k)
    tq = _tile_out(S, 256)
    tkv = _tile_div(S)                 # must divide S (keep-mask correctness)
    grid = (B, pl.cdiv(S, tq), S // tkv)
    return pl.pallas_call(
        functools.partial(_flash_attn_kernel, n_heads=n_heads, d_k=d_k,
                          scale=scale),
        out_shape=jax.ShapeDtypeStruct((B, S, D), jnp.bfloat16),
        grid=grid,
        in_specs=[
            pl.BlockSpec((1, tq, D), lambda b, qi, ki: (b, qi, 0)),
            pl.BlockSpec((1, tkv, 2 * D), lambda b, qi, ki: (b, ki, 0)),
            pl.BlockSpec((1, 1, tkv), lambda b, qi, ki: (b, 0, ki)),
        ],
        out_specs=pl.BlockSpec((1, tq, D), lambda b, qi, ki: (b, qi, 0)),
        scratch_shapes=[
            pltpu.VMEM((n_heads, tq, 1), jnp.float32),     # running max
            pltpu.VMEM((n_heads, tq, 1), jnp.float32),     # running sum
            pltpu.VMEM((n_heads, tq, d_k), jnp.float32),   # running output
        ],
        compiler_params=pltpu.CompilerParams(
            dimension_semantics=("parallel", "parallel", "arbitrary"),
            vmem_limit_bytes=_vmem_limit()),
    )(q, kv, keep)


# ----------------------------------------------------------------------------
# Model wrappers (plain-JAX glue around the Pallas kernels)
# ----------------------------------------------------------------------------
def positional_encoding(seq_len, d_model):
    # NOTE: assumes d_model is even (as in the reference module usage).
    position = jnp.arange(seq_len, dtype=jnp.float32)[:, None]
    div_term = jnp.exp(jnp.arange(0, d_model, 2, dtype=jnp.float32)
                       * (-(math.log(10000.0) / d_model)))
    pe = jnp.zeros((seq_len, d_model), jnp.float32)
    pe = pe.at[:, 0::2].set(jnp.sin(position * div_term))
    pe = pe.at[:, 1::2].set(jnp.cos(position * div_term))
    return pe


def transformer_block(x2d, keep, lp, *, B, S, D, n_heads):
    M = B * S
    # input sublayer: x + attention(norm(x))
    n1 = layernorm(x2d, lp["ln1_a"], lp["ln1_b"])                     # bf16
    q = linear(n1, lp["wq"], lp["bq"], out_dtype=jnp.bfloat16)        # (M, D)
    kv = linear(n1, lp["wkv"], lp["bkv"], out_dtype=jnp.bfloat16)     # (M, 2D)
    attn = flash_attention(q.reshape(B, S, D), kv.reshape(B, S, 2 * D),
                           keep, n_heads)                             # (B,S,D)
    x2d = linear(attn.reshape(M, D), lp["wo"], lp["bo"], residual=x2d)
    # output sublayer: x + ffn(norm(x)); FFN fully fused (w1 + GELU + w2)
    n2 = layernorm(x2d, lp["ln2_a"], lp["ln2_b"])                     # bf16
    x2d = ffn(n2, lp["w1"], lp["b1"], lp["w2"], lp["b2"], residual=x2d)
    return x2d  # dropout = identity (eval mode)


def bert_forward(tokens, params, *, pad_id, n_heads):
    B, S = tokens.shape
    D = params["token_emb"].shape[1]
    # keep[b, 0, j] = (tokens[b, j] != pad); broadcast across queries in-kernel
    keep = (tokens != pad_id).astype(jnp.float32).reshape(B, 1, S)
    # TODO(synk): token-embedding gather stays in plain JAX (no Pallas gather)
    x = params["token_emb"][tokens] + positional_encoding(S, D)[None, :, :]
    x2d = x.reshape(B * S, D)
    for lp in params["layers"]:
        x2d = transformer_block(x2d, keep, lp, B=B, S=S, D=D, n_heads=n_heads)
    return x2d.reshape(B, S, D)


# ----------------------------------------------------------------------------
# Parameter init (torch layout) + one-time packing into kernel layout
# ----------------------------------------------------------------------------
def init_params(key, vocab_size, hidden, n_layers, pad_id):
    keys = jax.random.split(key, 1 + n_layers)
    token_emb = 0.02 * jax.random.normal(keys[0], (vocab_size, hidden), jnp.float32)
    token_emb = token_emb.at[pad_id].set(0.0)  # padding_idx row is zero
    layers = []
    for li in range(n_layers):
        lk = jax.random.split(keys[1 + li], 6)
        d_ff = hidden * 4
        layers.append(dict(
            wq=0.02 * jax.random.normal(lk[0], (hidden, hidden), jnp.float32),
            bq=jnp.zeros((hidden,), jnp.float32),
            wk=0.02 * jax.random.normal(lk[1], (hidden, hidden), jnp.float32),
            bk=jnp.zeros((hidden,), jnp.float32),
            wv=0.02 * jax.random.normal(lk[2], (hidden, hidden), jnp.float32),
            bv=jnp.zeros((hidden,), jnp.float32),
            wo=0.02 * jax.random.normal(lk[3], (hidden, hidden), jnp.float32),
            bo=jnp.zeros((hidden,), jnp.float32),
            w1=0.02 * jax.random.normal(lk[4], (d_ff, hidden), jnp.float32),
            b1=jnp.zeros((d_ff,), jnp.float32),
            w2=0.02 * jax.random.normal(lk[5], (hidden, d_ff), jnp.float32),
            b2=jnp.zeros((hidden,), jnp.float32),
            ln1_a=jnp.ones((hidden,), jnp.float32),
            ln1_b=jnp.zeros((hidden,), jnp.float32),
            ln2_a=jnp.ones((hidden,), jnp.float32),
            ln2_b=jnp.zeros((hidden,), jnp.float32),
        ))
    return dict(token_emb=token_emb, layers=layers)


def prepare_params(params):
    """One-time packing: torch (N, K) weights -> (K, N) bf16, K/V fused."""
    layers = []
    for lp in params["layers"]:
        layers.append(dict(
            wq=lp["wq"].T.astype(jnp.bfloat16), bq=lp["bq"],
            wkv=jnp.concatenate([lp["wk"].T, lp["wv"].T],
                                axis=1).astype(jnp.bfloat16),        # (D, 2D)
            bkv=jnp.concatenate([lp["bk"], lp["bv"]]),               # (2D,)
            wo=lp["wo"].T.astype(jnp.bfloat16), bo=lp["bo"],
            w1=lp["w1"].T.astype(jnp.bfloat16), b1=lp["b1"],
            w2=lp["w2"].T.astype(jnp.bfloat16), b2=lp["b2"],
            ln1_a=lp["ln1_a"], ln1_b=lp["ln1_b"],
            ln2_a=lp["ln2_a"], ln2_b=lp["ln2_b"],
        ))
    return dict(token_emb=params["token_emb"], layers=layers)


if __name__ == "__main__":
    B, S, D, H, L = 2, 8, 32, 4, 2
    VOCAB, PAD_ID = 16, 0

    key = jax.random.PRNGKey(0)
    k_tok, k_par = jax.random.split(key)
    tokens = jax.random.randint(k_tok, (B, S), 0, VOCAB, dtype=jnp.int32)
    tokens = tokens.at[:, -2:].set(PAD_ID)  # make sure masking is exercised

    params = prepare_params(init_params(k_par, VOCAB, D, L, PAD_ID))

    fwd = jax.jit(functools.partial(bert_forward, pad_id=PAD_ID, n_heads=H))
    out = jax.block_until_ready(fwd(tokens, params))
    assert out.shape == (B, S, D) and out.dtype == jnp.float32
    print("KERNEL_OK")
</pallas_src>

<mosaic_0001>
module attributes {stable_mosaic.version = 11 : i64} {
  func.func @_layernorm_kernel(%arg0: i32, %arg1: memref<16x32xf32, #tpu.memory_space<vmem>>, %arg2: memref<1x32xf32, #tpu.memory_space<vmem>>, %arg3: memref<1x32xf32, #tpu.memory_space<vmem>>, %arg4: memref<16x32xbf16, #tpu.memory_space<vmem>>) attributes {dimension_semantics = [#tpu.dimension_semantics<parallel>], iteration_bounds = array<i64: 1>, scalar_prefetch = 0 : i64, scratch_operands = 0 : i64, tpu.core_type = #tpu.core_type<tc>, window_params = [{transform_indices = @transform_0, window_bounds = array<i64: 16, 32>}, {pipeline_mode = #tpu.pipeline_mode<synchronous>, transform_indices = @transform_1, window_bounds = array<i64: 1, 32>}, {pipeline_mode = #tpu.pipeline_mode<synchronous>, transform_indices = @transform_2, window_bounds = array<i64: 1, 32>}, {transform_indices = @transform_3, window_bounds = array<i64: 16, 32>}]} {
    %c0 = arith.constant 0 : index
    %c0_0 = arith.constant 0 : index
    %0 = vector.load %arg1[%c0, %c0_0] : memref<16x32xf32, #tpu.memory_space<vmem>>, vector<16x32xf32>
    %cst = arith.constant dense<0.000000e+00> : vector<16xf32>
    %1 = vector.multi_reduction <add>, %0, %cst [1] : vector<16x32xf32> to vector<16xf32>
    %2 = vector.shape_cast %1 : vector<16xf32> to vector<16x1xf32>
    %cst_1 = arith.constant 3.200000e+01 : f32
    %3 = vector.broadcast %cst_1 : f32 to vector<16x1xf32>
    %4 = arith.divf %2, %3 : vector<16x1xf32>
    %5 = vector.broadcast %4 : vector<16x1xf32> to vector<16x32xf32>
    %6 = arith.subf %0, %5 : vector<16x32xf32>
    %7 = arith.mulf %6, %6 : vector<16x32xf32>
    %cst_2 = arith.constant dense<0.000000e+00> : vector<16xf32>
    %8 = vector.multi_reduction <add>, %7, %cst_2 [1] : vector<16x32xf32> to vector<16xf32>
    %9 = vector.shape_cast %8 : vector<16xf32> to vector<16x1xf32>
    %cst_3 = arith.constant 0.0322580636 : f32
    %10 = vector.broadcast %cst_3 : f32 to vector<16x1xf32>
    %11 = arith.mulf %9, %10 : vector<16x1xf32>
    %12 = math.sqrt %11 : vector<16x1xf32>
    %cst_4 = arith.constant 9.99999997E-7 : f32
    %13 = vector.broadcast %cst_4 : f32 to vector<16x1xf32>
    %14 = arith.addf %12, %13 : vector<16x1xf32>
    %15 = tpu.reciprocal %14 {approx = true} : vector<16x1xf32> -> vector<16x1xf32>
    %c0_5 = arith.constant 0 : index
    %c0_6 = arith.constant 0 : index
    %16 = vector.load %arg2[%c0_5, %c0_6] : memref<1x32xf32, #tpu.memory_space<vmem>>, vector<1x32xf32>
    %17 = vector.broadcast %16 : vector<1x32xf32> to vector<16x32xf32>
    %18 = arith.mulf %17, %6 : vector<16x32xf32>
    %19 = vector.broadcast %15 : vector<16x1xf32> to vector<16x32xf32>
    %20 = arith.mulf %18, %19 : vector<16x32xf32>
    %c0_7 = arith.constant 0 : index
    %c0_8 = arith.constant 0 : index
    %21 = vector.load %arg3[%c0_7, %c0_8] : memref<1x32xf32, #tpu.memory_space<vmem>>, vector<1x32xf32>
    %22 = vector.broadcast %21 : vector<1x32xf32> to vector<16x32xf32>
    %23 = arith.addf %20, %22 : vector<16x32xf32>
    %24 = arith.truncf %23 : vector<16x32xf32> to vector<16x32xbf16>
    %c0_9 = arith.constant 0 : index
    %c0_10 = arith.constant 0 : index
    %25 = vector.load %arg4[%c0_9, %c0_10] : memref<16x32xbf16, #tpu.memory_space<vmem>>, vector<16x32xbf16>
    tpu.vector_store %arg4[%c0_9, %c0_10], %24 {strides = array<i32>} : memref<16x32xbf16, #tpu.memory_space<vmem>>, vector<16x32xbf16>,
    return
  }
  func.func @transform_0(%arg0: i32) -> (i32, i32) {
    %c0_i32 = arith.constant 0 : i32
    %c0_i32_0 = arith.constant 0 : i32
    return %arg0, %c0_i32 : i32, i32
  }
  func.func @transform_1(%arg0: i32) -> (i32, i32) {
    %c0_i32 = arith.constant 0 : i32
    %c0_i32_0 = arith.constant 0 : i32
    %c0_i32_1 = arith.constant 0 : i32
    return %c0_i32, %c0_i32_0 : i32, i32
  }
  func.func @transform_2(%arg0: i32) -> (i32, i32) {
    %c0_i32 = arith.constant 0 : i32
    %c0_i32_0 = arith.constant 0 : i32
    %c0_i32_1 = arith.constant 0 : i32
    return %c0_i32, %c0_i32_0 : i32, i32
  }
  func.func @transform_3(%arg0: i32) -> (i32, i32) {
    %c0_i32 = arith.constant 0 : i32
    %c0_i32_0 = arith.constant 0 : i32
    return %arg0, %c0_i32 : i32, i32
  }
}

module attributes {stable_mosaic.version = 11 : i64} {
  func.func @_linear_kernel(%arg0: i32, %arg1: i32, %arg2: i32, %arg3: memref<16x32xbf16, #tpu.memory_space<vmem>>, %arg4: memref<32x64xbf16, #tpu.memory_space<vmem>>, %arg5: memref<1x64xf32, #tpu.memory_space<vmem>>, %arg6: memref<16x64xbf16, #tpu.memory_space<vmem>>, %arg7: memref<16x64xf32, #tpu.memory_space<vmem>>) attributes {dimension_semantics = [#tpu.dimension_semantics<parallel>, #tpu.dimension_semantics<parallel>, #tpu.dimension_semantics<arbitrary>], iteration_bounds = array<i64: 1, 1, 1>, scalar_prefetch = 0 : i64, scratch_operands = 1 : i64, tpu.core_type = #tpu.core_type<tc>, window_params = [{transform_indices = @transform_0, window_bounds = array<i64: 16, 32>}, {transform_indices = @transform_1, window_bounds = array<i64: 32, 64>}, {transform_indices = @transform_2, window_bounds = array<i64: 1, 64>}, {transform_indices = @transform_3, window_bounds = array<i64: 16, 64>}]} {
    %c0_i32 = arith.constant 0 : i32
    %0 = arith.cmpi eq, %arg2, %c0_i32 : i32
    %1 = arith.extui %0 : i1 to i32
    %c0_i32_0 = arith.constant 0 : i32
    %2 = arith.cmpi ne, %1, %c0_i32_0 : i32
    scf.if %2 {
      %cst_10 = arith.constant 0.000000e+00 : f32
      %12 = vector.broadcast %cst_10 : f32 to vector<16x64xf32>
      %c0_11 = arith.constant 0 : index
      %c0_12 = arith.constant 0 : index
      %13 = vector.load %arg7[%c0_11, %c0_12] : memref<16x64xf32, #tpu.memory_space<vmem>>, vector<16x64xf32>
      tpu.vector_store %arg7[%c0_11, %c0_12], %12 {strides = array<i32>} : memref<16x64xf32, #tpu.memory_space<vmem>>, vector<16x64xf32>,
    } else {
    }
    %c0 = arith.constant 0 : index
    %c0_1 = arith.constant 0 : index
    %3 = vector.load %arg7[%c0, %c0_1] : memref<16x64xf32, #tpu.memory_space<vmem>>, vector<16x64xf32>
    %c0_2 = arith.constant 0 : index
    %c0_3 = arith.constant 0 : index
    %4 = vector.load %arg3[%c0_2, %c0_3] : memref<16x32xbf16, #tpu.memory_space<vmem>>, vector<16x32xbf16>
    %c0_4 = arith.constant 0 : index
    %c0_5 = arith.constant 0 : index
    %5 = vector.load %arg4[%c0_4, %c0_5] : memref<32x64xbf16, #tpu.memory_space<vmem>>, vector<32x64xbf16>
    %cst = arith.constant dense<0.000000e+00> : vector<16x64xf32>
    %6 = tpu.matmul %4, %5, %cst {dimension_numbers = #tpu.dot_dimension_numbers<[1], [0], [0], [1], [0, 0, 1, 1], [], []>} : vector<16x32xbf16>, vector<32x64xbf16>, vector<16x64xf32> -> vector<16x64xf32>
    %7 = arith.addf %3, %6 : vector<16x64xf32>
    %c0_6 = arith.constant 0 : index
    %c0_7 = arith.constant 0 : index
    %8 = vector.load %arg7[%c0_6, %c0_7] : memref<16x64xf32, #tpu.memory_space<vmem>>, vector<16x64xf32>
    tpu.vector_store %arg7[%c0_6, %c0_7], %7 {strides = array<i32>} : memref<16x64xf32, #tpu.memory_space<vmem>>, vector<16x64xf32>,
    %c0_i32_8 = arith.constant 0 : i32
    %9 = arith.cmpi eq, %arg2, %c0_i32_8 : i32
    %10 = arith.extui %9 : i1 to i32
    %c0_i32_9 = arith.constant 0 : i32
    %11 = arith.cmpi ne, %10, %c0_i32_9 : i32
    scf.if %11 {
      %c0_10 = arith.constant 0 : index
      %c0_11 = arith.constant 0 : index
      %12 = vector.load %arg7[%c0_10, %c0_11] : memref<16x64xf32, #tpu.memory_space<vmem>>, vector<16x64xf32>
      %c0_12 = arith.constant 0 : index
      %c0_13 = arith.constant 0 : index
      %13 = vector.load %arg5[%c0_12, %c0_13] : memref<1x64xf32, #tpu.memory_space<vmem>>, vector<1x64xf32>
      %14 = vector.broadcast %13 : vector<1x64xf32> to vector<16x64xf32>
      %15 = arith.addf %12, %14 : vector<16x64xf32>
      %16 = arith.truncf %15 : vector<16x64xf32> to vector<16x64xbf16>
      %c0_14 = arith.constant 0 : index
      %c0_15 = arith.constant 0 : index
      %17 = vector.load %arg6[%c0_14, %c0_15] : memref<16x64xbf16, #tpu.memory_space<vmem>>, vector<16x64xbf16>
      tpu.vector_store %arg6[%c0_14, %c0_15], %16 {strides = array<i32>} : memref<16x64xbf16, #tpu.memory_space<vmem>>, vector<16x64xbf16>,
    } else {
    }
    return
  }
  func.func @transform_0(%arg0: i32, %arg1: i32, %arg2: i32) -> (i32, i32) {
    %c0_i32 = arith.constant 0 : i32
    return %arg0, %arg2 : i32, i32
  }
  func.func @transform_1(%arg0: i32, %arg1: i32, %arg2: i32) -> (i32, i32) {
    %c0_i32 = arith.constant 0 : i32
    return %arg2, %arg1 : i32, i32
  }
  func.func @transform_2(%arg0: i32, %arg1: i32, %arg2: i32) -> (i32, i32) {
    %c0_i32 = arith.constant 0 : i32
    %c0_i32_0 = arith.constant 0 : i32
    return %c0_i32, %arg1 : i32, i32
  }
  func.func @transform_3(%arg0: i32, %arg1: i32, %arg2: i32) -> (i32, i32) {
    %c0_i32 = arith.constant 0 : i32
    return %arg0, %arg1 : i32, i32
  }
}

module attributes {stable_mosaic.version = 11 : i64} {
  func.func @_linear_kernel(%arg0: i32, %arg1: i32, %arg2: i32, %arg3: memref<16x32xbf16, #tpu.memory_space<vmem>>, %arg4: memref<32x32xbf16, #tpu.memory_space<vmem>>, %arg5: memref<1x32xf32, #tpu.memory_space<vmem>>, %arg6: memref<16x32xbf16, #tpu.memory_space<vmem>>, %arg7: memref<16x32xf32, #tpu.memory_space<vmem>>) attributes {dimension_semantics = [#tpu.dimension_semantics<parallel>, #tpu.dimension_semantics<parallel>, #tpu.dimension_semantics<arbitrary>], iteration_bounds = array<i64: 1, 1, 1>, scalar_prefetch = 0 : i64, scratch_operands = 1 : i64, tpu.core_type = #tpu.core_type<tc>, window_params = [{transform_indices = @transform_0, window_bounds = array<i64: 16, 32>}, {transform_indices = @transform_1, window_bounds = array<i64: 32, 32>}, {transform_indices = @transform_2, window_bounds = array<i64: 1, 32>}, {transform_indices = @transform_3, window_bounds = array<i64: 16, 32>}]} {
    %c0_i32 = arith.constant 0 : i32
    %0 = arith.cmpi eq, %arg2, %c0_i32 : i32
    %1 = arith.extui %0 : i1 to i32
    %c0_i32_0 = arith.constant 0 : i32
    %2 = arith.cmpi ne, %1, %c0_i32_0 : i32
    scf.if %2 {
      %cst_10 = arith.constant 0.000000e+00 : f32
      %12 = vector.broadcast %cst_10 : f32 to vector<16x32xf32>
      %c0_11 = arith.constant 0 : index
      %c0_12 = arith.constant 0 : index
      %13 = vector.load %arg7[%c0_11, %c0_12] : memref<16x32xf32, #tpu.memory_space<vmem>>, vector<16x32xf32>
      tpu.vector_store %arg7[%c0_11, %c0_12], %12 {strides = array<i32>} : memref<16x32xf32, #tpu.memory_space<vmem>>, vector<16x32xf32>,
    } else {
    }
    %c0 = arith.constant 0 : index
    %c0_1 = arith.constant 0 : index
    %3 = vector.load %arg7[%c0, %c0_1] : memref<16x32xf32, #tpu.memory_space<vmem>>, vector<16x32xf32>
    %c0_2 = arith.constant 0 : index
    %c0_3 = arith.constant 0 : index
    %4 = vector.load %arg3[%c0_2, %c0_3] : memref<16x32xbf16, #tpu.memory_space<vmem>>, vector<16x32xbf16>
    %c0_4 = arith.constant 0 : index
    %c0_5 = arith.constant 0 : index
    %5 = vector.load %arg4[%c0_4, %c0_5] : memref<32x32xbf16, #tpu.memory_space<vmem>>, vector<32x32xbf16>
    %cst = arith.constant dense<0.000000e+00> : vector<16x32xf32>
    %6 = tpu.matmul %4, %5, %cst {dimension_numbers = #tpu.dot_dimension_numbers<[1], [0], [0], [1], [0, 0, 1, 1], [], []>} : vector<16x32xbf16>, vector<32x32xbf16>, vector<16x32xf32> -> vector<16x32xf32>
    %7 = arith.addf %3, %6 : vector<16x32xf32>
    %c0_6 = arith.constant 0 : index
    %c0_7 = arith.constant 0 : index
    %8 = vector.load %arg7[%c0_6, %c0_7] : memref<16x32xf32, #tpu.memory_space<vmem>>, vector<16x32xf32>
    tpu.vector_store %arg7[%c0_6, %c0_7], %7 {strides = array<i32>} : memref<16x32xf32, #tpu.memory_space<vmem>>, vector<16x32xf32>,
    %c0_i32_8 = arith.constant 0 : i32
    %9 = arith.cmpi eq, %arg2, %c0_i32_8 : i32
    %10 = arith.extui %9 : i1 to i32
    %c0_i32_9 = arith.constant 0 : i32
    %11 = arith.cmpi ne, %10, %c0_i32_9 : i32
    scf.if %11 {
      %c0_10 = arith.constant 0 : index
      %c0_11 = arith.constant 0 : index
      %12 = vector.load %arg7[%c0_10, %c0_11] : memref<16x32xf32, #tpu.memory_space<vmem>>, vector<16x32xf32>
      %c0_12 = arith.constant 0 : index
      %c0_13 = arith.constant 0 : index
      %13 = vector.load %arg5[%c0_12, %c0_13] : memref<1x32xf32, #tpu.memory_space<vmem>>, vector<1x32xf32>
      %14 = vector.broadcast %13 : vector<1x32xf32> to vector<16x32xf32>
      %15 = arith.addf %12, %14 : vector<16x32xf32>
      %16 = arith.truncf %15 : vector<16x32xf32> to vector<16x32xbf16>
      %c0_14 = arith.constant 0 : index
      %c0_15 = arith.constant 0 : index
      %17 = vector.load %arg6[%c0_14, %c0_15] : memref<16x32xbf16, #tpu.memory_space<vmem>>, vector<16x32xbf16>
      tpu.vector_store %arg6[%c0_14, %c0_15], %16 {strides = array<i32>} : memref<16x32xbf16, #tpu.memory_space<vmem>>, vector<16x32xbf16>,
    } else {
    }
    return
  }
  func.func @transform_0(%arg0: i32, %arg1: i32, %arg2: i32) -> (i32, i32) {
    %c0_i32 = arith.constant 0 : i32
    return %arg0, %arg2 : i32, i32
  }
  func.func @transform_1(%arg0: i32, %arg1: i32, %arg2: i32) -> (i32, i32) {
    %c0_i32 = arith.constant 0 : i32
    return %arg2, %arg1 : i32, i32
  }
  func.func @transform_2(%arg0: i32, %arg1: i32, %arg2: i32) -> (i32, i32) {
    %c0_i32 = arith.constant 0 : i32
    %c0_i32_0 = arith.constant 0 : i32
    return %c0_i32, %arg1 : i32, i32
  }
  func.func @transform_3(%arg0: i32, %arg1: i32, %arg2: i32) -> (i32, i32) {
    %c0_i32 = arith.constant 0 : i32
    return %arg0, %arg1 : i32, i32
  }
}

module attributes {stable_mosaic.version = 11 : i64} {
  func.func @_flash_attn_kernel(%arg0: i32, %arg1: i32, %arg2: i32, %arg3: memref<1x8x32xbf16, #tpu.memory_space<vmem>>, %arg4: memref<1x8x64xbf16, #tpu.memory_space<vmem>>, %arg5: memref<1x1x8xf32, #tpu.memory_space<vmem>>, %arg6: memref<1x8x32xbf16, #tpu.memory_space<vmem>>, %arg7: memref<4x8x1xf32, #tpu.memory_space<vmem>>, %arg8: memref<4x8x1xf32, #tpu.memory_space<vmem>>, %arg9: memref<4x8x8xf32, #tpu.memory_space<vmem>>) attributes {dimension_semantics = [#tpu.dimension_semantics<parallel>, #tpu.dimension_semantics<parallel>, #tpu.dimension_semantics<arbitrary>], iteration_bounds = array<i64: 2, 1, 1>, scalar_prefetch = 0 : i64, scratch_operands = 3 : i64, tpu.core_type = #tpu.core_type<tc>, window_params = [{transform_indices = @transform_0, window_bounds = array<i64: 1, 8, 32>}, {transform_indices = @transform_1, window_bounds = array<i64: 1, 8, 64>}, {transform_indices = @transform_2, window_bounds = array<i64: 1, 1, 8>}, {transform_indices = @transform_3, window_bounds = array<i64: 1, 8, 32>}]} {
    %c0_i32 = arith.constant 0 : i32
    %0 = arith.cmpi eq, %arg2, %c0_i32 : i32
    %1 = arith.extui %0 : i1 to i32
    %c0_i32_0 = arith.constant 0 : i32
    %2 = arith.cmpi ne, %1, %c0_i32_0 : i32
    scf.if %2 {
      %cst_107 = arith.constant 0xFF800000 : f32
      %188 = vector.broadcast %cst_107 : f32 to vector<4x8x1xf32>
      %c0_108 = arith.constant 0 : index
      %c0_109 = arith.constant 0 : index
      %c0_110 = arith.constant 0 : index
      %189 = vector.load %arg7[%c0_108, %c0_109, %c0_110] : memref<4x8x1xf32, #tpu.memory_space<vmem>>, vector<4x8x1xf32>
      tpu.vector_store %arg7[%c0_108, %c0_109, %c0_110], %188 {strides = array<i32>} : memref<4x8x1xf32, #tpu.memory_space<vmem>>, vector<4x8x1xf32>,
      %cst_111 = arith.constant 0.000000e+00 : f32
      %190 = vector.broadcast %cst_111 : f32 to vector<4x8x1xf32>
      %c0_112 = arith.constant 0 : index
      %c0_113 = arith.constant 0 : index
      %c0_114 = arith.constant 0 : index
      %191 = vector.load %arg8[%c0_112, %c0_113, %c0_114] : memref<4x8x1xf32, #tpu.memory_space<vmem>>, vector<4x8x1xf32>
      tpu.vector_store %arg8[%c0_112, %c0_113, %c0_114], %190 {strides = array<i32>} : memref<4x8x1xf32, #tpu.memory_space<vmem>>, vector<4x8x1xf32>,
      %cst_115 = arith.constant 0.000000e+00 : f32
      %192 = vector.broadcast %cst_115 : f32 to vector<4x8x8xf32>
      %c0_116 = arith.constant 0 : index
      %c0_117 = arith.constant 0 : index
      %c0_118 = arith.constant 0 : index
      %193 = vector.load %arg9[%c0_116, %c0_117, %c0_118] : memref<4x8x8xf32, #tpu.memory_space<vmem>>, vector<4x8x8xf32>
      tpu.vector_store %arg9[%c0_116, %c0_117, %c0_118], %192 {strides = array<i32>} : memref<4x8x8xf32, #tpu.memory_space<vmem>>, vector<4x8x8xf32>,
    } else {
    }
    %c0 = arith.constant 0 : index
    %c0_1 = arith.constant 0 : index
    %c0_2 = arith.constant 0 : index
    %3 = vector.load %arg3[%c0, %c0_1, %c0_2] : memref<1x8x32xbf16, #tpu.memory_space<vmem>>, vector<1x8x32xbf16>
    %4 = vector.shape_cast %3 : vector<1x8x32xbf16> to vector<8x32xbf16>
    %c0_3 = arith.constant 0 : index
    %c0_4 = arith.constant 0 : index
    %c0_5 = arith.constant 0 : index
    %5 = vector.load %arg4[%c0_3, %c0_4, %c0_5] : memref<1x8x64xbf16, #tpu.memory_space<vmem>>, vector<1x8x64xbf16>
    %6 = vector.shape_cast %5 : vector<1x8x64xbf16> to vector<8x64xbf16>
    %c0_6 = arith.constant 0 : index
    %c0_7 = arith.constant 0 : index
    %c0_8 = arith.constant 0 : index
    %7 = vector.load %arg5[%c0_6, %c0_7, %c0_8] : memref<1x1x8xf32, #tpu.memory_space<vmem>>, vector<1x1x8xf32>
    %8 = vector.shape_cast %7 : vector<1x1x8xf32> to vector<1x8xf32>
    %9 = vector.extract_strided_slice %4 {offsets = [0, 0], sizes = [8, 8], strides = [1, 1]} : vector<8x32xbf16> to vector<8x8xbf16>
    %10 = vector.extract_strided_slice %6 {offsets = [0, 0], sizes = [8, 8], strides = [1, 1]} : vector<8x64xbf16> to vector<8x8xbf16>
    %11 = vector.extract_strided_slice %6 {offsets = [0, 32], sizes = [8, 8], strides = [1, 1]} : vector<8x64xbf16> to vector<8x8xbf16>
    %cst = arith.constant dense<0.000000e+00> : vector<8x8xf32>
    %12 = tpu.matmul %9, %10, %cst {dimension_numbers = #tpu.dot_dimension_numbers<[1], [1], [0], [0], [0, 0, 1, 0], [], []>} : vector<8x8xbf16>, vector<8x8xbf16>, vector<8x8xf32> -> vector<8x8xf32>
    %cst_9 = arith.constant 0.353553385 : f32
    %13 = vector.broadcast %cst_9 : f32 to vector<8x8xf32>
    %14 = arith.mulf %12, %13 : vector<8x8xf32>
    %cst_10 = arith.constant 0.000000e+00 : f32
    %15 = vector.broadcast %cst_10 : f32 to vector<1x8xf32>
    %16 = arith.cmpf oeq, %8, %15 : vector<1x8xf32>
    %cst_11 = arith.constant -1.000000e+09 : f32
    %17 = vector.shape_cast %16 : vector<1x8xi1> to vector<1x8xi1>
    %18 = vector.broadcast %17 : vector<1x8xi1> to vector<8x8xi1>
    %19 = vector.broadcast %cst_11 : f32 to vector<8x8xf32>
    %20 = arith.select %18, %19, %14 : vector<8x8xi1>, vector<8x8xf32>
    %c0_12 = arith.constant 0 : index
    %c0_13 = arith.constant 0 : index
    %c0_14 = arith.constant 0 : index
    %21 = vector.load %arg7[%c0_12, %c0_13, %c0_14] : memref<4x8x1xf32, #tpu.memory_space<vmem>>, vector<1x8x1xf32>
    %22 = vector.shape_cast %21 : vector<1x8x1xf32> to vector<8x1xf32>
    %cst_15 = arith.constant dense<0xFF800000> : vector<8xf32>
    %23 = vector.multi_reduction <maximumf>, %20, %cst_15 [1] : vector<8x8xf32> to vector<8xf32>
    %24 = vector.shape_cast %23 : vector<8xf32> to vector<8x1xf32>
    %25 = arith.maximumf %22, %24 : vector<8x1xf32>
    %26 = arith.subf %22, %25 : vector<8x1xf32>
    %27 = math.exp %26 : vector<8x1xf32>
    %28 = vector.broadcast %25 : vector<8x1xf32> to vector<8x8xf32>
    %29 = arith.subf %20, %28 : vector<8x8xf32>
    %30 = math.exp %29 : vector<8x8xf32>
    %c0_16 = arith.constant 0 : index
    %c0_17 = arith.constant 0 : index
    %c0_18 = arith.constant 0 : index
    %31 = vector.load %arg8[%c0_16, %c0_17, %c0_18] : memref<4x8x1xf32, #tpu.memory_space<vmem>>, vector<1x8x1xf32>
    %32 = vector.shape_cast %31 : vector<1x8x1xf32> to vector<8x1xf32>
    %33 = arith.mulf %27, %32 : vector<8x1xf32>
    %cst_19 = arith.constant dense<0.000000e+00> : vector<8xf32>
    %34 = vector.multi_reduction <add>, %30, %cst_19 [1] : vector<8x8xf32> to vector<8xf32>
    %35 = vector.shape_cast %34 : vector<8xf32> to vector<8x1xf32>
    %36 = arith.addf %33, %35 : vector<8x1xf32>
    %c0_20 = arith.constant 0 : index
    %c0_21 = arith.constant 0 : index
    %c0_22 = arith.constant 0 : index
    %37 = vector.load %arg8[%c0_20, %c0_21, %c0_22] : memref<4x8x1xf32, #tpu.memory_space<vmem>>, vector<1x8x1xf32>
    %38 = vector.shape_cast %37 : vector<1x8x1xf32> to vector<8x1xf32>
    %39 = vector.shape_cast %36 : vector<8x1xf32> to vector<1x8x1xf32>
    tpu.vector_store %arg8[%c0_20, %c0_21, %c0_22], %39 {strides = array<i32>} : memref<4x8x1xf32, #tpu.memory_space<vmem>>, vector<1x8x1xf32>,
    %c0_23 = arith.constant 0 : index
    %c0_24 = arith.constant 0 : index
    %c0_25 = arith.constant 0 : index
    %40 = vector.load %arg9[%c0_23, %c0_24, %c0_25] : memref<4x8x8xf32, #tpu.memory_space<vmem>>, vector<1x8x8xf32>
    %41 = vector.shape_cast %40 : vector<1x8x8xf32> to vector<8x8xf32>
    %42 = vector.broadcast %27 : vector<8x1xf32> to vector<8x8xf32>
    %43 = arith.mulf %42, %41 : vector<8x8xf32>
    %44 = arith.truncf %30 : vector<8x8xf32> to vector<8x8xbf16>
    %cst_26 = arith.constant dense<0.000000e+00> : vector<8x8xf32>
    %45 = tpu.matmul %44, %11, %cst_26 {dimension_numbers = #tpu.dot_dimension_numbers<[1], [0], [0], [1], [0, 0, 1, 1], [], []>} : vector<8x8xbf16>, vector<8x8xbf16>, vector<8x8xf32> -> vector<8x8xf32>
    %46 = arith.addf %43, %45 : vector<8x8xf32>
    %c0_27 = arith.constant 0 : index
    %c0_28 = arith.constant 0 : index
    %c0_29 = arith.constant 0 : index
    %47 = vector.load %arg9[%c0_27, %c0_28, %c0_29] : memref<4x8x8xf32, #tpu.memory_space<vmem>>, vector<1x8x8xf32>
    %48 = vector.shape_cast %47 : vector<1x8x8xf32> to vector<8x8xf32>
    %49 = vector.shape_cast %46 : vector<8x8xf32> to vector<1x8x8xf32>
    tpu.vector_store %arg9[%c0_27, %c0_28, %c0_29], %49 {strides = array<i32>} : memref<4x8x8xf32, #tpu.memory_space<vmem>>, vector<1x8x8xf32>,
    %c0_30 = arith.constant 0 : index
    %c0_31 = arith.constant 0 : index
    %c0_32 = arith.constant 0 : index
    %50 = vector.load %arg7[%c0_30, %c0_31, %c0_32] : memref<4x8x1xf32, #tpu.memory_space<vmem>>, vector<1x8x1xf32>
    %51 = vector.shape_cast %50 : vector<1x8x1xf32> to vector<8x1xf32>
    %52 = vector.shape_cast %25 : vector<8x1xf32> to vector<1x8x1xf32>
    tpu.vector_store %arg7[%c0_30, %c0_31, %c0_32], %52 {strides = array<i32>} : memref<4x8x1xf32, #tpu.memory_space<vmem>>, vector<1x8x1xf32>,
    %53 = vector.extract_strided_slice %4 {offsets = [0, 8], sizes = [8, 8], strides = [1, 1]} : vector<8x32xbf16> to vector<8x8xbf16>
    %54 = vector.extract_strided_slice %6 {offsets = [0, 8], sizes = [8, 8], strides = [1, 1]} : vector<8x64xbf16> to vector<8x8xbf16>
    %55 = vector.extract_strided_slice %6 {offsets = [0, 40], sizes = [8, 8], strides = [1, 1]} : vector<8x64xbf16> to vector<8x8xbf16>
    %cst_33 = arith.constant dense<0.000000e+00> : vector<8x8xf32>
    %56 = tpu.matmul %53, %54, %cst_33 {dimension_numbers = #tpu.dot_dimension_numbers<[1], [1], [0], [0], [0, 0, 1, 0], [], []>} : vector<8x8xbf16>, vector<8x8xbf16>, vector<8x8xf32> -> vector<8x8xf32>
    %cst_34 = arith.constant 0.353553385 : f32
    %57 = vector.broadcast %cst_34 : f32 to vector<8x8xf32>
    %58 = arith.mulf %56, %57 : vector<8x8xf32>
    %cst_35 = arith.constant 0.000000e+00 : f32
    %59 = vector.broadcast %cst_35 : f32 to vector<1x8xf32>
    %60 = arith.cmpf oeq, %8, %59 : vector<1x8xf32>
    %cst_36 = arith.constant -1.000000e+09 : f32
    %61 = vector.shape_cast %60 : vector<1x8xi1> to vector<1x8xi1>
    %62 = vector.broadcast %61 : vector<1x8xi1> to vector<8x8xi1>
    %63 = vector.broadcast %cst_36 : f32 to vector<8x8xf32>
    %64 = arith.select %62, %63, %58 : vector<8x8xi1>, vector<8x8xf32>
    %c1 = arith.constant 1 : index
    %c0_37 = arith.constant 0 : index
    %c0_38 = arith.constant 0 : index
    %65 = vector.load %arg7[%c1, %c0_37, %c0_38] : memref<4x8x1xf32, #tpu.memory_space<vmem>>, vector<1x8x1xf32>
    %66 = vector.shape_cast %65 : vector<1x8x1xf32> to vector<8x1xf32>
    %cst_39 = arith.constant dense<0xFF800000> : vector<8xf32>
    %67 = vector.multi_reduction <maximumf>, %64, %cst_39 [1] : vector<8x8xf32> to vector<8xf32>
    %68 = vector.shape_cast %67 : vector<8xf32> to vector<8x1xf32>
    %69 = arith.maximumf %66, %68 : vector<8x1xf32>
    %70 = arith.subf %66, %69 : vector<8x1xf32>
    %71 = math.exp %70 : vector<8x1xf32>
    %72 = vector.broadcast %69 : vector<8x1xf32> to vector<8x8xf32>
    %73 = arith.subf %64, %72 : vector<8x8xf32>
    %74 = math.exp %73 : vector<8x8xf32>
    %c1_40 = arith.constant 1 : index
    %c0_41 = arith.constant 0 : index
    %c0_42 = arith.constant 0 : index
    %75 = vector.load %arg8[%c1_40, %c0_41, %c0_42] : memref<4x8x1xf32, #tpu.memory_space<vmem>>, vector<1x8x1xf32>
    %76 = vector.shape_cast %75 : vector<1x8x1xf32> to vector<8x1xf32>
    %77 = arith.mulf %71, %76 : vector<8x1xf32>
    %cst_43 = arith.constant dense<0.000000e+00> : vector<8xf32>
    %78 = vector.multi_reduction <add>, %74, %cst_43 [1] : vector<8x8xf32> to vector<8xf32>
    %79 = vector.shape_cast %78 : vector<8xf32> to vector<8x1xf32>
    %80 = arith.addf %77, %79 : vector<8x1xf32>
    %c1_44 = arith.constant 1 : index
    %c0_45 = arith.constant 0 : index
    %c0_46 = arith.constant 0 : index
    %81 = vector.load %arg8[%c1_44, %c0_45, %c0_46] : memref<4x8x1xf32, #tpu.memory_space<vmem>>, vector<1x8x1xf32>
    %82 = vector.shape_cast %81 : vector<1x8x1xf32> to vector<8x1xf32>
    %83 = vector.shape_cast %80 : vector<8x1xf32> to vector<1x8x1xf32>
    tpu.vector_store %arg8[%c1_44, %c0_45, %c0_46], %83 {strides = array<i32>} : memref<4x8x1xf32, #tpu.memory_space<vmem>>, vector<1x8x1xf32>,
    %c1_47 = arith.constant 1 : index
    %c0_48 = arith.constant 0 : index
    %c0_49 = arith.constant 0 : index
    %84 = vector.load %arg9[%c1_47, %c0_48, %c0_49] : memref<4x8x8xf32, #tpu.memory_space<vmem>>, vector<1x8x8xf32>
    %85 = vector.shape_cast %84 : vector<1x8x8xf32> to vector<8x8xf32>
    %86 = vector.broadcast %71 : vector<8x1xf32> to vector<8x8xf32>
    %87 = arith.mulf %86, %85 : vector<8x8xf32>
    %88 = arith.truncf %74 : vector<8x8xf32> to vector<8x8xbf16>
    %cst_50 = arith.constant dense<0.000000e+00> : vector<8x8xf32>
    %89 = tpu.matmul %88, %55, %cst_50 {dimension_numbers = #tpu.dot_dimension_numbers<[1], [0], [0], [1], [0, 0, 1, 1], [], []>} : vector<8x8xbf16>, vector<8x8xbf16>, vector<8x8xf32> -> vector<8x8xf32>
    %90 = arith.addf %87, %89 : vector<8x8xf32>
    %c1_51 = arith.constant 1 : index
    %c0_52 = arith.constant 0 : index
    %c0_53 = arith.constant 0 : index
    %91 = vector.load %arg9[%c1_51, %c0_52, %c0_53] : memref<4x8x8xf32, #tpu.memory_space<vmem>>, vector<1x8x8xf32>
    %92 = vector.shape_cast %91 : vector<1x8x8xf32> to vector<8x8xf32>
    %93 = vector.shape_cast %90 : vector<8x8xf32> to vector<1x8x8xf32>
    tpu.vector_store %arg9[%c1_51, %c0_52, %c0_53], %93 {strides = array<i32>} : memref<4x8x8xf32, #tpu.memory_space<vmem>>, vector<1x8x8xf32>,
    %c1_54 = arith.constant 1 : index
    %c0_55 = arith.constant 0 : index
    %c0_56 = arith.constant 0 : index
    %94 = vector.load %arg7[%c1_54, %c0_55, %c0_56] : memref<4x8x1xf32, #tpu.memory_space<vmem>>, vector<1x8x1xf32>
    %95 = vector.shape_cast %94 : vector<1x8x1xf32> to vector<8x1xf32>
    %96 = vector.shape_cast %69 : vector<8x1xf32> to vector<1x8x1xf32>
    tpu.vector_store %arg7[%c1_54, %c0_55, %c0_56], %96 {strides = array<i32>} : memref<4x8x1xf32, #tpu.memory_space<vmem>>, vector<1x8x1xf32>,
    %97 = vector.extract_strided_slice %4 {offsets = [0, 16], sizes = [8, 8], strides = [1, 1]} : vector<8x32xbf16> to vector<8x8xbf16>
    %98 = vector.extract_strided_slice %6 {offsets = [0, 16], sizes = [8, 8], strides = [1, 1]} : vector<8x64xbf16> to vector<8x8xbf16>
    %99 = vector.extract_strided_slice %6 {offsets = [0, 48], sizes = [8, 8], strides = [1, 1]} : vector<8x64xbf16> to vector<8x8xbf16>
    %cst_57 = arith.constant dense<0.000000e+00> : vector<8x8xf32>
    %100 = tpu.matmul %97, %98, %cst_57 {dimension_numbers = #tpu.dot_dimension_numbers<[1], [1], [0], [0], [0, 0, 1, 0], [], []>} : vector<8x8xbf16>, vector<8x8xbf16>, vector<8x8xf32> -> vector<8x8xf32>
    %cst_58 = arith.constant 0.353553385 : f32
    %101 = vector.broadcast %cst_58 : f32 to vector<8x8xf32>
    %102 = arith.mulf %100, %101 : vector<8x8xf32>
    %cst_59 = arith.constant 0.000000e+00 : f32
    %103 = vector.broadcast %cst_59 : f32 to vector<1x8xf32>
    %104 = arith.cmpf oeq, %8, %103 : vector<1x8xf32>
    %cst_60 = arith.constant -1.000000e+09 : f32
    %105 = vector.shape_cast %104 : vector<1x8xi1> to vector<1x8xi1>
    %106 = vector.broadcast %105 : vector<1x8xi1> to vector<8x8xi1>
    %107 = vector.broadcast %cst_60 : f32 to vector<8x8xf32>
    %108 = arith.select %106, %107, %102 : vector<8x8xi1>, vector<8x8xf32>
    %c2 = arith.constant 2 : index
    %c0_61 = arith.constant 0 : index
    %c0_62 = arith.constant 0 : index
    %109 = vector.load %arg7[%c2, %c0_61, %c0_62] : memref<4x8x1xf32, #tpu.memory_space<vmem>>, vector<1x8x1xf32>
    %110 = vector.shape_cast %109 : vector<1x8x1xf32> to vector<8x1xf32>
    %cst_63 = arith.constant dense<0xFF800000> : vector<8xf32>
    %111 = vector.multi_reduction <maximumf>, %108, %cst_63 [1] : vector<8x8xf32> to vector<8xf32>
    %112 = vector.shape_cast %111 : vector<8xf32> to vector<8x1xf32>
    %113 = arith.maximumf %110, %112 : vector<8x1xf32>
    %114 = arith.subf %110, %113 : vector<8x1xf32>
    %115 = math.exp %114 : vector<8x1xf32>
    %116 = vector.broadcast %113 : vector<8x1xf32> to vector<8x8xf32>
    %117 = arith.subf %108, %116 : vector<8x8xf32>
    %118 = math.exp %117 : vector<8x8xf32>
    %c2_64 = arith.constant 2 : index
    %c0_65 = arith.constant 0 : index
    %c0_66 = arith.constant 0 : index
    %119 = vector.load %arg8[%c2_64, %c0_65, %c0_66] : memref<4x8x1xf32, #tpu.memory_space<vmem>>, vector<1x8x1xf32>
    %120 = vector.shape_cast %119 : vector<1x8x1xf32> to vector<8x1xf32>
    %121 = arith.mulf %115, %120 : vector<8x1xf32>
    %cst_67 = arith.constant dense<0.000000e+00> : vector<8xf32>
    %122 = vector.multi_reduction <add>, %118, %cst_67 [1] : vector<8x8xf32> to vector<8xf32>
    %123 = vector.shape_cast %122 : vector<8xf32> to vector<8x1xf32>
    %124 = arith.addf %121, %123 : vector<8x1xf32>
    %c2_68 = arith.constant 2 : index
    %c0_69 = arith.constant 0 : index
    %c0_70 = arith.constant 0 : index
    %125 = vector.load %arg8[%c2_68, %c0_69, %c0_70] : memref<4x8x1xf32, #tpu.memory_space<vmem>>, vector<1x8x1xf32>
    %126 = vector.shape_cast %125 : vector<1x8x1xf32> to vector<8x1xf32>
    %127 = vector.shape_cast %124 : vector<8x1xf32> to vector<1x8x1xf32>
    tpu.vector_store %arg8[%c2_68, %c0_69, %c0_70], %127 {strides = array<i32>} : memref<4x8x1xf32, #tpu.memory_space<vmem>>, vector<1x8x1xf32>,
    %c2_71 = arith.constant 2 : index
    %c0_72 = arith.constant 0 : index
    %c0_73 = arith.constant 0 : index
    %128 = vector.load %arg9[%c2_71, %c0_72, %c0_73] : memref<4x8x8xf32, #tpu.memory_space<vmem>>, vector<1x8x8xf32>
    %129 = vector.shape_cast %128 : vector<1x8x8xf32> to vector<8x8xf32>
    %130 = vector.broadcast %115 : vector<8x1xf32> to vector<8x8xf32>
    %131 = arith.mulf %130, %129 : vector<8x8xf32>
    %132 = arith.truncf %118 : vector<8x8xf32> to vector<8x8xbf16>
    %cst_74 = arith.constant dense<0.000000e+00> : vector<8x8xf32>
    %133 = tpu.matmul %132, %99, %cst_74 {dimension_numbers = #tpu.dot_dimension_numbers<[1], [0], [0], [1], [0, 0, 1, 1], [], []>} : vector<8x8xbf16>, vector<8x8xbf16>, vector<8x8xf32> -> vector<8x8xf32>
    %134 = arith.addf %131, %133 : vector<8x8xf32>
    %c2_75 = arith.constant 2 : index
    %c0_76 = arith.constant 0 : index
    %c0_77 = arith.constant 0 : index
    %135 = vector.load %arg9[%c2_75, %c0_76, %c0_77] : memref<4x8x8xf32, #tpu.memory_space<vmem>>, vector<1x8x8xf32>
    %136 = vector.shape_cast %135 : vector<1x8x8xf32> to vector<8x8xf32>
    %137 = vector.shape_cast %134 : vector<8x8xf32> to vector<1x8x8xf32>
    tpu.vector_store %arg9[%c2_75, %c0_76, %c0_77], %137 {strides = array<i32>} : memref<4x8x8xf32, #tpu.memory_space<vmem>>, vector<1x8x8xf32>,
    %c2_78 = arith.constant 2 : index
    %c0_79 = arith.constant 0 : index
    %c0_80 = arith.constant 0 : index
    %138 = vector.load %arg7[%c2_78, %c0_79, %c0_80] : memref<4x8x1xf32, #tpu.memory_space<vmem>>, vector<1x8x1xf32>
    %139 = vector.shape_cast %138 : vector<1x8x1xf32> to vector<8x1xf32>
    %140 = vector.shape_cast %113 : vector<8x1xf32> to vector<1x8x1xf32>
    tpu.vector_store %arg7[%c2_78, %c0_79, %c0_80], %140 {strides = array<i32>} : memref<4x8x1xf32, #tpu.memory_space<vmem>>, vector<1x8x1xf32>,
    %141 = vector.extract_strided_slice %4 {offsets = [0, 24], sizes = [8, 8], strides = [1, 1]} : vector<8x32xbf16> to vector<8x8xbf16>
    %142 = vector.extract_strided_slice %6 {offsets = [0, 24], sizes = [8, 8], strides = [1, 1]} : vector<8x64xbf16> to vector<8x8xbf16>
    %143 = vector.extract_strided_slice %6 {offsets = [0, 56], sizes = [8, 8], strides = [1, 1]} : vector<8x64xbf16> to vector<8x8xbf16>
    %cst_81 = arith.constant dense<0.000000e+00> : vector<8x8xf32>
    %144 = tpu.matmul %141, %142, %cst_81 {dimension_numbers = #tpu.dot_dimension_numbers<[1], [1], [0], [0], [0, 0, 1, 0], [], []>} : vector<8x8xbf16>, vector<8x8xbf16>, vector<8x8xf32> -> vector<8x8xf32>
    %cst_82 = arith.constant 0.353553385 : f32
    %145 = vector.broadcast %cst_82 : f32 to vector<8x8xf32>
    %146 = arith.mulf %144, %145 : vector<8x8xf32>
    %cst_83 = arith.constant 0.000000e+00 : f32
    %147 = vector.broadcast %cst_83 : f32 to vector<1x8xf32>
    %148 = arith.cmpf oeq, %8, %147 : vector<1x8xf32>
    %cst_84 = arith.constant -1.000000e+09 : f32
    %149 = vector.shape_cast %148 : vector<1x8xi1> to vector<1x8xi1>
    %150 = vector.broadcast %149 : vector<1x8xi1> to vector<8x8xi1>
    %151 = vector.broadcast %cst_84 : f32 to vector<8x8xf32>
    %152 = arith.select %150, %151, %146 : vector<8x8xi1>, vector<8x8xf32>
    %c3 = arith.constant 3 : index
    %c0_85 = arith.constant 0 : index
    %c0_86 = arith.constant 0 : index
    %153 = vector.load %arg7[%c3, %c0_85, %c0_86] : memref<4x8x1xf32, #tpu.memory_space<vmem>>, vector<1x8x1xf32>
    %154 = vector.shape_cast %153 : vector<1x8x1xf32> to vector<8x1xf32>
    %cst_87 = arith.constant dense<0xFF800000> : vector<8xf32>
    %155 = vector.multi_reduction <maximumf>, %152, %cst_87 [1] : vector<8x8xf32> to vector<8xf32>
    %156 = vector.shape_cast %155 : vector<8xf32> to vector<8x1xf32>
    %157 = arith.maximumf %154, %156 : vector<8x1xf32>
    %158 = arith.subf %154, %157 : vector<8x1xf32>
    %159 = math.exp %158 : vector<8x1xf32>
    %160 = vector.broadcast %157 : vector<8x1xf32> to vector<8x8xf32>
    %161 = arith.subf %152, %160 : vector<8x8xf32>
    %162 = math.exp %161 : vector<8x8xf32>
    %c3_88 = arith.constant 3 : index
    %c0_89 = arith.constant 0 : index
    %c0_90 = arith.constant 0 : index
    %163 = vector.load %arg8[%c3_88, %c0_89, %c0_90] : memref<4x8x1xf32, #tpu.memory_space<vmem>>, vector<1x8x1xf32>
    %164 = vector.shape_cast %163 : vector<1x8x1xf32> to vector<8x1xf32>
    %165 = arith.mulf %159, %164 : vector<8x1xf32>
    %cst_91 = arith.constant dense<0.000000e+00> : vector<8xf32>
    %166 = vector.multi_reduction <add>, %162, %cst_91 [1] : vector<8x8xf32> to vector<8xf32>
    %167 = vector.shape_cast %166 : vector<8xf32> to vector<8x1xf32>
    %168 = arith.addf %165, %167 : vector<8x1xf32>
    %c3_92 = arith.constant 3 : index
    %c0_93 = arith.constant 0 : index
    %c0_94 = arith.constant 0 : index
    %169 = vector.load %arg8[%c3_92, %c0_93, %c0_94] : memref<4x8x1xf32, #tpu.memory_space<vmem>>, vector<1x8x1xf32>
    %170 = vector.shape_cast %169 : vector<1x8x1xf32> to vector<8x1xf32>
    %171 = vector.shape_cast %168 : vector<8x1xf32> to vector<1x8x1xf32>
    tpu.vector_store %arg8[%c3_92, %c0_93, %c0_94], %171 {strides = array<i32>} : memref<4x8x1xf32, #tpu.memory_space<vmem>>, vector<1x8x1xf32>,
    %c3_95 = arith.constant 3 : index
    %c0_96 = arith.constant 0 : index
    %c0_97 = arith.constant 0 : index
    %172 = vector.load %arg9[%c3_95, %c0_96, %c0_97] : memref<4x8x8xf32, #tpu.memory_space<vmem>>, vector<1x8x8xf32>
    %173 = vector.shape_cast %172 : vector<1x8x8xf32> to vector<8x8xf32>
    %174 = vector.broadcast %159 : vector<8x1xf32> to vector<8x8xf32>
    %175 = arith.mulf %174, %173 : vector<8x8xf32>
    %176 = arith.truncf %162 : vector<8x8xf32> to vector<8x8xbf16>
    %cst_98 = arith.constant dense<0.000000e+00> : vector<8x8xf32>
    %177 = tpu.matmul %176, %143, %cst_98 {dimension_numbers = #tpu.dot_dimension_numbers<[1], [0], [0], [1], [0, 0, 1, 1], [], []>} : vector<8x8xbf16>, vector<8x8xbf16>, vector<8x8xf32> -> vector<8x8xf32>
    %178 = arith.addf %175, %177 : vector<8x8xf32>
    %c3_99 = arith.constant 3 : index
    %c0_100 = arith.constant 0 : index
    %c0_101 = arith.constant 0 : index
    %179 = vector.load %arg9[%c3_99, %c0_100, %c0_101] : memref<4x8x8xf32, #tpu.memory_space<vmem>>, vector<1x8x8xf32>
    %180 = vector.shape_cast %179 : vector<1x8x8xf32> to vector<8x8xf32>
    %181 = vector.shape_cast %178 : vector<8x8xf32> to vector<1x8x8xf32>
    tpu.vector_store %arg9[%c3_99, %c0_100, %c0_101], %181 {strides = array<i32>} : memref<4x8x8xf32, #tpu.memory_space<vmem>>, vector<1x8x8xf32>,
    %c3_102 = arith.constant 3 : index
    %c0_103 = arith.constant 0 : index
    %c0_104 = arith.constant 0 : index
    %182 = vector.load %arg7[%c3_102, %c0_103, %c0_104] : memref<4x8x1xf32, #tpu.memory_space<vmem>>, vector<1x8x1xf32>
    %183 = vector.shape_cast %182 : vector<1x8x1xf32> to vector<8x1xf32>
    %184 = vector.shape_cast %157 : vector<8x1xf32> to vector<1x8x1xf32>
    tpu.vector_store %arg7[%c3_102, %c0_103, %c0_104], %184 {strides = array<i32>} : memref<4x8x1xf32, #tpu.memory_space<vmem>>, vector<1x8x1xf32>,
    %c0_i32_105 = arith.constant 0 : i32
    %185 = arith.cmpi eq, %arg2, %c0_i32_105 : i32
    %186 = arith.extui %185 : i1 to i32
    %c0_i32_106 = arith.constant 0 : i32
    %187 = arith.cmpi ne, %186, %c0_i32_106 : i32
    scf.if %187 {
      %c0_107 = arith.constant 0 : index
      %c0_108 = arith.constant 0 : index
      %c0_109 = arith.constant 0 : index
      %188 = vector.load %arg9[%c0_107, %c0_108, %c0_109] : memref<4x8x8xf32, #tpu.memory_space<vmem>>, vector<1x8x8xf32>
      %189 = vector.shape_cast %188 : vector<1x8x8xf32> to vector<8x8xf32>
      %c0_110 = arith.constant 0 : index
      %c0_111 = arith.constant 0 : index
      %c0_112 = arith.constant 0 : index
      %190 = vector.load %arg8[%c0_110, %c0_111, %c0_112] : memref<4x8x1xf32, #tpu.memory_space<vmem>>, vector<1x8x1xf32>
      %191 = vector.shape_cast %190 : vector<1x8x1xf32> to vector<8x1xf32>
      %192 = tpu.reciprocal %191 {approx = true} : vector<8x1xf32> -> vector<8x1xf32>
      %193 = vector.broadcast %192 : vector<8x1xf32> to vector<8x8xf32>
      %194 = arith.mulf %189, %193 : vector<8x8xf32>
      %195 = arith.truncf %194 : vector<8x8xf32> to vector<8x8xbf16>
      %c0_113 = arith.constant 0 : index
      %c0_114 = arith.constant 0 : index
      %c0_115 = arith.constant 0 : index
      %196 = vector.load %arg6[%c0_113, %c0_114, %c0_115] : memref<1x8x32xbf16, #tpu.memory_space<vmem>>, vector<1x8x8xbf16>
      %197 = vector.shape_cast %196 : vector<1x8x8xbf16> to vector<8x8xbf16>
      %198 = vector.shape_cast %195 : vector<8x8xbf16> to vector<1x8x8xbf16>
      tpu.vector_store %arg6[%c0_113, %c0_114, %c0_115], %198 {strides = array<i32>} : memref<1x8x32xbf16, #tpu.memory_space<vmem>>, vector<1x8x8xbf16>,
      %c1_116 = arith.constant 1 : index
      %c0_117 = arith.constant 0 : index
      %c0_118 = arith.constant 0 : index
      %199 = vector.load %arg9[%c1_116, %c0_117, %c0_118] : memref<4x8x8xf32, #tpu.memory_space<vmem>>, vector<1x8x8xf32>
      %200 = vector.shape_cast %199 : vector<1x8x8xf32> to vector<8x8xf32>
      %c1_119 = arith.constant 1 : index
      %c0_120 = arith.constant 0 : index
      %c0_121 = arith.constant 0 : index
      %201 = vector.load %arg8[%c1_119, %c0_120, %c0_121] : memref<4x8x1xf32, #tpu.memory_space<vmem>>, vector<1x8x1xf32>
      %202 = vector.shape_cast %201 : vector<1x8x1xf32> to vector<8x1xf32>
      %203 = tpu.reciprocal %202 {approx = true} : vector<8x1xf32> -> vector<8x1xf32>
      %204 = vector.broadcast %203 : vector<8x1xf32> to vector<8x8xf32>
      %205 = arith.mulf %200, %204 : vector<8x8xf32>
      %206 = arith.truncf %205 : vector<8x8xf32> to vector<8x8xbf16>
      %c0_122 = arith.constant 0 : index
      %c0_123 = arith.constant 0 : index
      %c8 = arith.constant 8 : index
      %207 = vector.load %arg6[%c0_122, %c0_123, %c8] : memref<1x8x32xbf16, #tpu.memory_space<vmem>>, vector<1x8x8xbf16>
      %208 = vector.shape_cast %207 : vector<1x8x8xbf16> to vector<8x8xbf16>
      %209 = vector.shape_cast %206 : vector<8x8xbf16> to vector<1x8x8xbf16>
      tpu.vector_store %arg6[%c0_122, %c0_123, %c8], %209 {strides = array<i32>} : memref<1x8x32xbf16, #tpu.memory_space<vmem>>, vector<1x8x8xbf16>,
      %c2_124 = arith.constant 2 : index
      %c0_125 = arith.constant 0 : index
      %c0_126 = arith.constant 0 : index
      %210 = vector.load %arg9[%c2_124, %c0_125, %c0_126] : memref<4x8x8xf32, #tpu.memory_space<vmem>>, vector<1x8x8xf32>
      %211 = vector.shape_cast %210 : vector<1x8x8xf32> to vector<8x8xf32>
      %c2_127 = arith.constant 2 : index
      %c0_128 = arith.constant 0 : index
      %c0_129 = arith.constant 0 : index
      %212 = vector.load %arg8[%c2_127, %c0_128, %c0_129] : memref<4x8x1xf32, #tpu.memory_space<vmem>>, vector<1x8x1xf32>
      %213 = vector.shape_cast %212 : vector<1x8x1xf32> to vector<8x1xf32>
      %214 = tpu.reciprocal %213 {approx = true} : vector<8x1xf32> -> vector<8x1xf32>
      %215 = vector.broadcast %214 : vector<8x1xf32> to vector<8x8xf32>
      %216 = arith.mulf %211, %215 : vector<8x8xf32>
      %217 = arith.truncf %216 : vector<8x8xf32> to vector<8x8xbf16>
      %c0_130 = arith.constant 0 : index
      %c0_131 = arith.constant 0 : index
      %c16 = arith.constant 16 : index
      %218 = vector.load %arg6[%c0_130, %c0_131, %c16] : memref<1x8x32xbf16, #tpu.memory_space<vmem>>, vector<1x8x8xbf16>
      %219 = vector.shape_cast %218 : vector<1x8x8xbf16> to vector<8x8xbf16>
      %220 = vector.shape_cast %217 : vector<8x8xbf16> to vector<1x8x8xbf16>
      tpu.vector_store %arg6[%c0_130, %c0_131, %c16], %220 {strides = array<i32>} : memref<1x8x32xbf16, #tpu.memory_space<vmem>>, vector<1x8x8xbf16>,
      %c3_132 = arith.constant 3 : index
      %c0_133 = arith.constant 0 : index
      %c0_134 = arith.constant 0 : index
      %221 = vector.load %arg9[%c3_132, %c0_133, %c0_134] : memref<4x8x8xf32, #tpu.memory_space<vmem>>, vector<1x8x8xf32>
      %222 = vector.shape_cast %221 : vector<1x8x8xf32> to vector<8x8xf32>
      %c3_135 = arith.constant 3 : index
      %c0_136 = arith.constant 0 : index
      %c0_137 = arith.constant 0 : index
      %223 = vector.load %arg8[%c3_135, %c0_136, %c0_137] : memref<4x8x1xf32, #tpu.memory_space<vmem>>, vector<1x8x1xf32>
      %224 = vector.shape_cast %223 : vector<1x8x1xf32> to vector<8x1xf32>
      %225 = tpu.reciprocal %224 {approx = true} : vector<8x1xf32> -> vector<8x1xf32>
      %226 = vector.broadcast %225 : vector<8x1xf32> to vector<8x8xf32>
      %227 = arith.mulf %222, %226 : vector<8x8xf32>
      %228 = arith.truncf %227 : vector<8x8xf32> to vector<8x8xbf16>
      %c0_138 = arith.constant 0 : index
      %c0_139 = arith.constant 0 : index
      %c24 = arith.constant 24 : index
      %229 = vector.load %arg6[%c0_138, %c0_139, %c24] : memref<1x8x32xbf16, #tpu.memory_space<vmem>>, vector<1x8x8xbf16>
      %230 = vector.shape_cast %229 : vector<1x8x8xbf16> to vector<8x8xbf16>
      %231 = vector.shape_cast %228 : vector<8x8xbf16> to vector<1x8x8xbf16>
      tpu.vector_store %arg6[%c0_138, %c0_139, %c24], %231 {strides = array<i32>} : memref<1x8x32xbf16, #tpu.memory_space<vmem>>, vector<1x8x8xbf16>,
    } else {
    }
    return
  }
  func.func @transform_0(%arg0: i32, %arg1: i32, %arg2: i32) -> (i32, i32, i32) {
    %c0_i32 = arith.constant 0 : i32
    %c0_i32_0 = arith.constant 0 : i32
    return %arg0, %arg1, %c0_i32 : i32, i32, i32
  }
  func.func @transform_1(%arg0: i32, %arg1: i32, %arg2: i32) -> (i32, i32, i32) {
    %c0_i32 = arith.constant 0 : i32
    %c0_i32_0 = arith.constant 0 : i32
    return %arg0, %arg2, %c0_i32 : i32, i32, i32
  }
  func.func @transform_2(%arg0: i32, %arg1: i32, %arg2: i32) -> (i32, i32, i32) {
    %c0_i32 = arith.constant 0 : i32
    %c0_i32_0 = arith.constant 0 : i32
    return %arg0, %c0_i32, %arg2 : i32, i32, i32
  }
  func.func @transform_3(%arg0: i32, %arg1: i32, %arg2: i32) -> (i32, i32, i32) {
    %c0_i32 = arith.constant 0 : i32
    %c0_i32_0 = arith.constant 0 : i32
    return %arg0, %arg1, %c0_i32 : i32, i32, i32
  }
}

module attributes {stable_mosaic.version = 11 : i64} {
  func.func @_linear_kernel(%arg0: i32, %arg1: i32, %arg2: i32, %arg3: memref<16x32xbf16, #tpu.memory_space<vmem>>, %arg4: memref<32x32xbf16, #tpu.memory_space<vmem>>, %arg5: memref<1x32xf32, #tpu.memory_space<vmem>>, %arg6: memref<16x32xf32, #tpu.memory_space<vmem>>, %arg7: memref<16x32xf32, #tpu.memory_space<vmem>>, %arg8: memref<16x32xf32, #tpu.memory_space<vmem>>) attributes {dimension_semantics = [#tpu.dimension_semantics<parallel>, #tpu.dimension_semantics<parallel>, #tpu.dimension_semantics<arbitrary>], iteration_bounds = array<i64: 1, 1, 1>, scalar_prefetch = 0 : i64, scratch_operands = 1 : i64, tpu.core_type = #tpu.core_type<tc>, window_params = [{transform_indices = @transform_0, window_bounds = array<i64: 16, 32>}, {transform_indices = @transform_1, window_bounds = array<i64: 32, 32>}, {transform_indices = @transform_2, window_bounds = array<i64: 1, 32>}, {transform_indices = @transform_3, window_bounds = array<i64: 16, 32>}, {transform_indices = @transform_4, window_bounds = array<i64: 16, 32>}]} {
    %c0_i32 = arith.constant 0 : i32
    %0 = arith.cmpi eq, %arg2, %c0_i32 : i32
    %1 = arith.extui %0 : i1 to i32
    %c0_i32_0 = arith.constant 0 : i32
    %2 = arith.cmpi ne, %1, %c0_i32_0 : i32
    scf.if %2 {
      %cst_10 = arith.constant 0.000000e+00 : f32
      %12 = vector.broadcast %cst_10 : f32 to vector<16x32xf32>
      %c0_11 = arith.constant 0 : index
      %c0_12 = arith.constant 0 : index
      %13 = vector.load %arg8[%c0_11, %c0_12] : memref<16x32xf32, #tpu.memory_space<vmem>>, vector<16x32xf32>
      tpu.vector_store %arg8[%c0_11, %c0_12], %12 {strides = array<i32>} : memref<16x32xf32, #tpu.memory_space<vmem>>, vector<16x32xf32>,
    } else {
    }
    %c0 = arith.constant 0 : index
    %c0_1 = arith.constant 0 : index
    %3 = vector.load %arg8[%c0, %c0_1] : memref<16x32xf32, #tpu.memory_space<vmem>>, vector<16x32xf32>
    %c0_2 = arith.constant 0 : index
    %c0_3 = arith.constant 0 : index
    %4 = vector.load %arg3[%c0_2, %c0_3] : memref<16x32xbf16, #tpu.memory_space<vmem>>, vector<16x32xbf16>
    %c0_4 = arith.constant 0 : index
    %c0_5 = arith.constant 0 : index
    %5 = vector.load %arg4[%c0_4, %c0_5] : memref<32x32xbf16, #tpu.memory_space<vmem>>, vector<32x32xbf16>
    %cst = arith.constant dense<0.000000e+00> : vector<16x32xf32>
    %6 = tpu.matmul %4, %5, %cst {dimension_numbers = #tpu.dot_dimension_numbers<[1], [0], [0], [1], [0, 0, 1, 1], [], []>} : vector<16x32xbf16>, vector<32x32xbf16>, vector<16x32xf32> -> vector<16x32xf32>
    %7 = arith.addf %3, %6 : vector<16x32xf32>
    %c0_6 = arith.constant 0 : index
    %c0_7 = arith.constant 0 : index
    %8 = vector.load %arg8[%c0_6, %c0_7] : memref<16x32xf32, #tpu.memory_space<vmem>>, vector<16x32xf32>
    tpu.vector_store %arg8[%c0_6, %c0_7], %7 {strides = array<i32>} : memref<16x32xf32, #tpu.memory_space<vmem>>, vector<16x32xf32>,
    %c0_i32_8 = arith.constant 0 : i32
    %9 = arith.cmpi eq, %arg2, %c0_i32_8 : i32
    %10 = arith.extui %9 : i1 to i32
    %c0_i32_9 = arith.constant 0 : i32
    %11 = arith.cmpi ne, %10, %c0_i32_9 : i32
    scf.if %11 {
      %c0_10 = arith.constant 0 : index
      %c0_11 = arith.constant 0 : index
      %12 = vector.load %arg8[%c0_10, %c0_11] : memref<16x32xf32, #tpu.memory_space<vmem>>, vector<16x32xf32>
      %c0_12 = arith.constant 0 : index
      %c0_13 = arith.constant 0 : index
      %13 = vector.load %arg5[%c0_12, %c0_13] : memref<1x32xf32, #tpu.memory_space<vmem>>, vector<1x32xf32>
      %14 = vector.broadcast %13 : vector<1x32xf32> to vector<16x32xf32>
      %15 = arith.addf %12, %14 : vector<16x32xf32>
      %c0_14 = arith.constant 0 : index
      %c0_15 = arith.constant 0 : index
      %16 = vector.load %arg6[%c0_14, %c0_15] : memref<16x32xf32, #tpu.memory_space<vmem>>, vector<16x32xf32>
      %17 = arith.addf %15, %16 : vector<16x32xf32>
      %c0_16 = arith.constant 0 : index
      %c0_17 = arith.constant 0 : index
      %18 = vector.load %arg7[%c0_16, %c0_17] : memref<16x32xf32, #tpu.memory_space<vmem>>, vector<16x32xf32>
      tpu.vector_store %arg7[%c0_16, %c0_17], %17 {strides = array<i32>} : memref<16x32xf32, #tpu.memory_space<vmem>>, vector<16x32xf32>,
    } else {
    }
    return
  }
  func.func @transform_0(%arg0: i32, %arg1: i32, %arg2: i32) -> (i32, i32) {
    %c0_i32 = arith.constant 0 : i32
    return %arg0, %arg2 : i32, i32
  }
  func.func @transform_1(%arg0: i32, %arg1: i32, %arg2: i32) -> (i32, i32) {
    %c0_i32 = arith.constant 0 : i32
    return %arg2, %arg1 : i32, i32
  }
  func.func @transform_2(%arg0: i32, %arg1: i32, %arg2: i32) -> (i32, i32) {
    %c0_i32 = arith.constant 0 : i32
    %c0_i32_0 = arith.constant 0 : i32
    return %c0_i32, %arg1 : i32, i32
  }
  func.func @transform_3(%arg0: i32, %arg1: i32, %arg2: i32) -> (i32, i32) {
    %c0_i32 = arith.constant 0 : i32
    return %arg0, %arg1 : i32, i32
  }
  func.func @transform_4(%arg0: i32, %arg1: i32, %arg2: i32) -> (i32, i32) {
    %c0_i32 = arith.constant 0 : i32
    return %arg0, %arg1 : i32, i32
  }
}

module attributes {stable_mosaic.version = 11 : i64} {
  func.func @_ffn_kernel(%arg0: i32, %arg1: i32, %arg2: memref<16x32xbf16, #tpu.memory_space<vmem>>, %arg3: memref<32x128xbf16, #tpu.memory_space<vmem>>, %arg4: memref<1x128xf32, #tpu.memory_space<vmem>>, %arg5: memref<128x32xbf16, #tpu.memory_space<vmem>>, %arg6: memref<1x32xf32, #tpu.memory_space<vmem>>, %arg7: memref<16x32xf32, #tpu.memory_space<vmem>>, %arg8: memref<16x32xf32, #tpu.memory_space<vmem>>, %arg9: memref<16x32xf32, #tpu.memory_space<vmem>>) attributes {dimension_semantics = [#tpu.dimension_semantics<parallel>, #tpu.dimension_semantics<arbitrary>], iteration_bounds = array<i64: 1, 1>, scalar_prefetch = 0 : i64, scratch_operands = 1 : i64, tpu.core_type = #tpu.core_type<tc>, window_params = [{transform_indices = @transform_0, window_bounds = array<i64: 16, 32>}, {transform_indices = @transform_1, window_bounds = array<i64: 32, 128>}, {transform_indices = @transform_2, window_bounds = array<i64: 1, 128>}, {transform_indices = @transform_3, window_bounds = array<i64: 128, 32>}, {pipeline_mode = #tpu.pipeline_mode<synchronous>, transform_indices = @transform_4, window_bounds = array<i64: 1, 32>}, {transform_indices = @transform_5, window_bounds = array<i64: 16, 32>}, {transform_indices = @transform_6, window_bounds = array<i64: 16, 32>}]} {
    %c0_i32 = arith.constant 0 : i32
    %0 = arith.cmpi eq, %arg1, %c0_i32 : i32
    %1 = arith.extui %0 : i1 to i32
    %c0_i32_0 = arith.constant 0 : i32
    %2 = arith.cmpi ne, %1, %c0_i32_0 : i32
    scf.if %2 {
      %cst_18 = arith.constant 0.000000e+00 : f32
      %26 = vector.broadcast %cst_18 : f32 to vector<16x32xf32>
      %c0_19 = arith.constant 0 : index
      %c0_20 = arith.constant 0 : index
      %27 = vector.load %arg9[%c0_19, %c0_20] : memref<16x32xf32, #tpu.memory_space<vmem>>, vector<16x32xf32>
      tpu.vector_store %arg9[%c0_19, %c0_20], %26 {strides = array<i32>} : memref<16x32xf32, #tpu.memory_space<vmem>>, vector<16x32xf32>,
    } else {
    }
    %c0 = arith.constant 0 : index
    %c0_1 = arith.constant 0 : index
    %3 = vector.load %arg2[%c0, %c0_1] : memref<16x32xbf16, #tpu.memory_space<vmem>>, vector<16x32xbf16>
    %c0_2 = arith.constant 0 : index
    %c0_3 = arith.constant 0 : index
    %4 = vector.load %arg3[%c0_2, %c0_3] : memref<32x128xbf16, #tpu.memory_space<vmem>>, vector<32x128xbf16>
    %cst = arith.constant dense<0.000000e+00> : vector<16x128xf32>
    %5 = tpu.matmul %3, %4, %cst {dimension_numbers = #tpu.dot_dimension_numbers<[1], [0], [0], [1], [0, 0, 1, 1], [], []>} : vector<16x32xbf16>, vector<32x128xbf16>, vector<16x128xf32> -> vector<16x128xf32>
    %c0_4 = arith.constant 0 : index
    %c0_5 = arith.constant 0 : index
    %6 = vector.load %arg4[%c0_4, %c0_5] : memref<1x128xf32, #tpu.memory_space<vmem>>, vector<1x128xf32>
    %7 = vector.broadcast %6 : vector<1x128xf32> to vector<16x128xf32>
    %8 = arith.addf %5, %7 : vector<16x128xf32>
    %cst_6 = arith.constant 5.000000e-01 : f32
    %9 = vector.broadcast %cst_6 : f32 to vector<16x128xf32>
    %10 = arith.mulf %9, %8 : vector<16x128xf32>
    %cst_7 = arith.constant 0.707106769 : f32
    %11 = vector.broadcast %cst_7 : f32 to vector<16x128xf32>
    %12 = arith.mulf %8, %11 : vector<16x128xf32>
    %13 = math.erf %12 : vector<16x128xf32>
    %cst_8 = arith.constant 1.000000e+00 : f32
    %14 = vector.broadcast %cst_8 : f32 to vector<16x128xf32>
    %15 = arith.addf %14, %13 : vector<16x128xf32>
    %16 = arith.mulf %10, %15 : vector<16x128xf32>
    %c0_9 = arith.constant 0 : index
    %c0_10 = arith.constant 0 : index
    %17 = vector.load %arg9[%c0_9, %c0_10] : memref<16x32xf32, #tpu.memory_space<vmem>>, vector<16x32xf32>
    %18 = arith.truncf %16 : vector<16x128xf32> to vector<16x128xbf16>
    %c0_11 = arith.constant 0 : index
    %c0_12 = arith.constant 0 : index
    %19 = vector.load %arg5[%c0_11, %c0_12] : memref<128x32xbf16, #tpu.memory_space<vmem>>, vector<128x32xbf16>
    %cst_13 = arith.constant dense<0.000000e+00> : vector<16x32xf32>
    %20 = tpu.matmul %18, %19, %cst_13 {dimension_numbers = #tpu.dot_dimension_numbers<[1], [0], [0], [1], [0, 0, 1, 1], [], []>} : vector<16x128xbf16>, vector<128x32xbf16>, vector<16x32xf32> -> vector<16x32xf32>
    %21 = arith.addf %17, %20 : vector<16x32xf32>
    %c0_14 = arith.constant 0 : index
    %c0_15 = arith.constant 0 : index
    %22 = vector.load %arg9[%c0_14, %c0_15] : memref<16x32xf32, #tpu.memory_space<vmem>>, vector<16x32xf32>
    tpu.vector_store %arg9[%c0_14, %c0_15], %21 {strides = array<i32>} : memref<16x32xf32, #tpu.memory_space<vmem>>, vector<16x32xf32>,
    %c0_i32_16 = arith.constant 0 : i32
    %23 = arith.cmpi eq, %arg1, %c0_i32_16 : i32
    %24 = arith.extui %23 : i1 to i32
    %c0_i32_17 = arith.constant 0 : i32
    %25 = arith.cmpi ne, %24, %c0_i32_17 : i32
    scf.if %25 {
      %c0_18 = arith.constant 0 : index
      %c0_19 = arith.constant 0 : index
      %26 = vector.load %arg9[%c0_18, %c0_19] : memref<16x32xf32, #tpu.memory_space<vmem>>, vector<16x32xf32>
      %c0_20 = arith.constant 0 : index
      %c0_21 = arith.constant 0 : index
      %27 = vector.load %arg6[%c0_20, %c0_21] : memref<1x32xf32, #tpu.memory_space<vmem>>, vector<1x32xf32>
      %28 = vector.broadcast %27 : vector<1x32xf32> to vector<16x32xf32>
      %29 = arith.addf %26, %28 : vector<16x32xf32>
      %c0_22 = arith.constant 0 : index
      %c0_23 = arith.constant 0 : index
      %30 = vector.load %arg7[%c0_22, %c0_23] : memref<16x32xf32, #tpu.memory_space<vmem>>, vector<16x32xf32>
      %31 = arith.addf %29, %30 : vector<16x32xf32>
      %c0_24 = arith.constant 0 : index
      %c0_25 = arith.constant 0 : index
      %32 = vector.load %arg8[%c0_24, %c0_25] : memref<16x32xf32, #tpu.memory_space<vmem>>, vector<16x32xf32>
      tpu.vector_store %arg8[%c0_24, %c0_25], %31 {strides = array<i32>} : memref<16x32xf32, #tpu.memory_space<vmem>>, vector<16x32xf32>,
    } else {
    }
    return
  }
  func.func @transform_0(%arg0: i32, %arg1: i32) -> (i32, i32) {
    %c0_i32 = arith.constant 0 : i32
    %c0_i32_0 = arith.constant 0 : i32
    return %arg0, %c0_i32 : i32, i32
  }
  func.func @transform_1(%arg0: i32, %arg1: i32) -> (i32, i32) {
    %c0_i32 = arith.constant 0 : i32
    %c0_i32_0 = arith.constant 0 : i32
    return %c0_i32, %arg1 : i32, i32
  }
  func.func @transform_2(%arg0: i32, %arg1: i32) -> (i32, i32) {
    %c0_i32 = arith.constant 0 : i32
    %c0_i32_0 = arith.constant 0 : i32
    return %c0_i32, %arg1 : i32, i32
  }
  func.func @transform_3(%arg0: i32, %arg1: i32) -> (i32, i32) {
    %c0_i32 = arith.constant 0 : i32
    %c0_i32_0 = arith.constant 0 : i32
    return %arg1, %c0_i32 : i32, i32
  }
  func.func @transform_4(%arg0: i32, %arg1: i32) -> (i32, i32) {
    %c0_i32 = arith.constant 0 : i32
    %c0_i32_0 = arith.constant 0 : i32
    %c0_i32_1 = arith.constant 0 : i32
    return %c0_i32, %c0_i32_0 : i32, i32
  }
  func.func @transform_5(%arg0: i32, %arg1: i32) -> (i32, i32) {
    %c0_i32 = arith.constant 0 : i32
    %c0_i32_0 = arith.constant 0 : i32
    return %arg0, %c0_i32 : i32, i32
  }
  func.func @transform_6(%arg0: i32, %arg1: i32) -> (i32, i32) {
    %c0_i32 = arith.constant 0 : i32
    %c0_i32_0 = arith.constant 0 : i32
    return %arg0, %c0_i32 : i32, i32
  }
}

module attributes {stable_mosaic.version = 11 : i64} {
  func.func @_ffn_kernel(%arg0: i32, %arg1: i32, %arg2: memref<16x32xbf16, #tpu.memory_space<vmem>>, %arg3: memref<32x128xbf16, #tpu.memory_space<vmem>>, %arg4: memref<1x128xf32, #tpu.memory_space<vmem>>, %arg5: memref<128x32xbf16, #tpu.memory_space<vmem>>, %arg6: memref<1x32xf32, #tpu.memory_space<vmem>>, %arg7: memref<16x32xf32, #tpu.memory_space<vmem>>, %arg8: memref<16x32xf32, #tpu.memory_space<vmem>>, %arg9: memref<16x32xf32, #tpu.memory_space<vmem>>) attributes {dimension_semantics = [#tpu.dimension_semantics<parallel>, #tpu.dimension_semantics<arbitrary>], iteration_bounds = array<i64: 1, 1>, scalar_prefetch = 0 : i64, scratch_operands = 1 : i64, tpu.core_type = #tpu.core_type<tc>, window_params = [{transform_indices = @transform_0, window_bounds = array<i64: 16, 32>}, {transform_indices = @transform_1, window_bounds = array<i64: 32, 128>}, {transform_indices = @transform_2, window_bounds = array<i64: 1, 128>}, {transform_indices = @transform_3, window_bounds = array<i64: 128, 32>}, {pipeline_mode = #tpu.pipeline_mode<synchronous>, transform_indices = @transform_4, window_bounds = array<i64: 1, 32>}, {transform_indices = @transform_5, window_bounds = array<i64: 16, 32>}, {transform_indices = @transform_6, window_bounds = array<i64: 16, 32>}]} {
    %c0_i32 = arith.constant 0 : i32
    %0 = arith.cmpi eq, %arg1, %c0_i32 : i32
    %1 = arith.extui %0 : i1 to i32
    %c0_i32_0 = arith.constant 0 : i32
    %2 = arith.cmpi ne, %1, %c0_i32_0 : i32
    scf.if %2 {
      %cst_18 = arith.constant 0.000000e+00 : f32
      %26 = vector.broadcast %cst_18 : f32 to vector<16x32xf32>
      %c0_19 = arith.constant 0 : index
      %c0_20 = arith.constant 0 : index
      %27 = vector.load %arg9[%c0_19, %c0_20] : memref<16x32xf32, #tpu.memory_space<vmem>>, vector<16x32xf32>
      tpu.vector_store %arg9[%c0_19, %c0_20], %26 {strides = array<i32>} : memref<16x32xf32, #tpu.memory_space<vmem>>, vector<16x32xf32>,
    } else {
    }
    %c0 = arith.constant 0 : index
    %c0_1 = arith.constant 0 : index
    %3 = vector.load %arg2[%c0, %c0_1] : memref<16x32xbf16, #tpu.memory_space<vmem>>, vector<16x32xbf16>
    %c0_2 = arith.constant 0 : index
    %c0_3 = arith.constant 0 : index
    %4 = vector.load %arg3[%c0_2, %c0_3] : memref<32x128xbf16, #tpu.memory_space<vmem>>, vector<32x128xbf16>
    %cst = arith.constant dense<0.000000e+00> : vector<16x128xf32>
    %5 = tpu.matmul %3, %4, %cst {dimension_numbers = #tpu.dot_dimension_numbers<[1], [0], [0], [1], [0, 0, 1, 1], [], []>} : vector<16x32xbf16>, vector<32x128xbf16>, vector<16x128xf32> -> vector<16x128xf32>
    %c0_4 = arith.constant 0 : index
    %c0_5 = arith.constant 0 : index
    %6 = vector.load %arg4[%c0_4, %c0_5] : memref<1x128xf32, #tpu.memory_space<vmem>>, vector<1x128xf32>
    %7 = vector.broadcast %6 : vector<1x128xf32> to vector<16x128xf32>
    %8 = arith.addf %5, %7 : vector<16x128xf32>
    %cst_6 = arith.constant 5.000000e-01 : f32
    %9 = vector.broadcast %cst_6 : f32 to vector<16x128xf32>
    %10 = arith.mulf %9, %8 : vector<16x128xf32>
    %cst_7 = arith.constant 0.707106769 : f32
    %11 = vector.broadcast %cst_7 : f32 to vector<16x128xf32>
    %12 = arith.mulf %8, %11 : vector<16x128xf32>
    %13 = math.erf %12 : vector<16x128xf32>
    %cst_8 = arith.constant 1.000000e+00 : f32
    %14 = vector.broadcast %cst_8 : f32 to vector<16x128xf32>
    %15 = arith.addf %14, %13 : vector<16x128xf32>
    %16 = arith.mulf %10, %15 : vector<16x128xf32>
    %c0_9 = arith.constant 0 : index
    %c0_10 = arith.constant 0 : index
    %17 = vector.load %arg9[%c0_9, %c0_10] : memref<16x32xf32, #tpu.memory_space<vmem>>, vector<16x32xf32>
    %18 = arith.truncf %16 : vector<16x128xf32> to vector<16x128xbf16>
    %c0_11 = arith.constant 0 : index
    %c0_12 = arith.constant 0 : index
    %19 = vector.load %arg5[%c0_11, %c0_12] : memref<128x32xbf16, #tpu.memory_space<vmem>>, vector<128x32xbf16>
    %cst_13 = arith.constant dense<0.000000e+00> : vector<16x32xf32>
    %20 = tpu.matmul %18, %19, %cst_13 {dimension_numbers = #tpu.dot_dimension_numbers<[1], [0], [0], [1], [0, 0, 1, 1], [], []>} : vector<16x128xbf16>, vector<128x32xbf16>, vector<16x32xf32> -> vector<16x32xf32>
    %21 = arith.addf %17, %20 : vector<16x32xf32>
    %c0_14 = arith.constant 0 : index
    %c0_15 = arith.constant 0 : index
    %22 = vector.load %arg9[%c0_14, %c0_15] : memref<16x32xf32, #tpu.memory_space<vmem>>, vector<16x32xf32>
    tpu.vector_store %arg9[%c0_14, %c0_15], %21 {strides = array<i32>} : memref<16x32xf32, #tpu.memory_space<vmem>>, vector<16x32xf32>,
    %c0_i32_16 = arith.constant 0 : i32
    %23 = arith.cmpi eq, %arg1, %c0_i32_16 : i32
    %24 = arith.extui %23 : i1 to i32
    %c0_i32_17 = arith.constant 0 : i32
    %25 = arith.cmpi ne, %24, %c0_i32_17 : i32
    scf.if %25 {
      %c0_18 = arith.constant 0 : index
      %c0_19 = arith.constant 0 : index
      %26 = vector.load %arg9[%c0_18, %c0_19] : memref<16x32xf32, #tpu.memory_space<vmem>>, vector<16x32xf32>
      %c0_20 = arith.constant 0 : index
      %c0_21 = arith.constant 0 : index
      %27 = vector.load %arg6[%c0_20, %c0_21] : memref<1x32xf32, #tpu.memory_space<vmem>>, vector<1x32xf32>
      %28 = vector.broadcast %27 : vector<1x32xf32> to vector<16x32xf32>
      %29 = arith.addf %26, %28 : vector<16x32xf32>
      %c0_22 = arith.constant 0 : index
      %c0_23 = arith.constant 0 : index
      %30 = vector.load %arg7[%c0_22, %c0_23] : memref<16x32xf32, #tpu.memory_space<vmem>>, vector<16x32xf32>
      %31 = arith.addf %29, %30 : vector<16x32xf32>
      %c0_24 = arith.constant 0 : index
      %c0_25 = arith.constant 0 : index
      %32 = vector.load %arg8[%c0_24, %c0_25] : memref<16x32xf32, #tpu.memory_space<vmem>>, vector<16x32xf32>
      tpu.vector_store %arg8[%c0_24, %c0_25], %31 {strides = array<i32>} : memref<16x32xf32, #tpu.memory_space<vmem>>, vector<16x32xf32>,
    } else {
    }
    return
  }
  func.func @transform_0(%arg0: i32, %arg1: i32) -> (i32, i32) {
    %c0_i32 = arith.constant 0 : i32
    %c0_i32_0 = arith.constant 0 : i32
    return %arg0, %c0_i32 : i32, i32
  }
  func.func @transform_1(%arg0: i32, %arg1: i32) -> (i32, i32) {
    %c0_i32 = arith.constant 0 : i32
    %c0_i32_0 = arith.constant 0 : i32
    return %c0_i32, %arg1 : i32, i32
  }
  func.func @transform_2(%arg0: i32, %arg1: i32) -> (i32, i32) {
    %c0_i32 = arith.constant 0 : i32
    %c0_i32_0 = arith.constant 0 : i32
    return %c0_i32, %arg1 : i32, i32
  }
  func.func @transform_3(%arg0: i32, %arg1: i32) -> (i32, i32) {
    %c0_i32 = arith.constant 0 : i32
    %c0_i32_0 = arith.constant 0 : i32
    return %arg1, %c0_i32 : i32, i32
  }
  func.func @transform_4(%arg0: i32, %arg1: i32) -> (i32, i32) {
    %c0_i32 = arith.constant 0 : i32
    %c0_i32_0 = arith.constant 0 : i32
    %c0_i32_1 = arith.constant 0 : i32
    return %c0_i32, %c0_i32_0 : i32, i32
  }
  func.func @transform_5(%arg0: i32, %arg1: i32) -> (i32, i32) {
    %c0_i32 = arith.constant 0 : i32
    %c0_i32_0 = arith.constant 0 : i32
    return %arg0, %c0_i32 : i32, i32
  }
  func.func @transform_6(%arg0: i32, %arg1: i32) -> (i32, i32) {
    %c0_i32 = arith.constant 0 : i32
    %c0_i32_0 = arith.constant 0 : i32
    return %arg0, %c0_i32 : i32, i32
  }
}

</mosaic_0001>

<bundles_post_ra>
// kernel: bert_forward.14
= control target key start
LH: loop header
LB: loop body
LE: loop exit
PB: predicated region body
PF: predicated region fallthrough
CT: control target
= control target key end

     0   :  { %vm16_vm0 = vcmask 261120   ;;  %vm84_vm5 = vcmask 257024   ;;  %s147_s0 = inlined_call_operand.vmem [shape: f32[16,32], index: 0, kind: input, shape index: {}]   ;;  %s148_s1 = inlined_call_operand.vmem [shape: f32[1,32], index: 1, kind: input, shape index: {}]   ;;  %s149_s2 = inlined_call_operand.vmem [shape: f32[1,32], index: 2, kind: input, shape index: {}]   ;;  %s150_s3 = inlined_call_operand.vmem [shape: bf16[16,32], index: 3, kind: output, shape index: {}]  }
   0x1   :  { %v14_v0 = vld [vmem:[%s147_s0] sm:$0xff]  ;;  %v15_v1 = vld [vmem:[%s147_s0 + $0x8] sm:$0xff] }
   0x2   :  { %v17_v2 = vsel %vm16_vm0, %v14_v0, 0.0  ;;  %v20_v3 = vsel %vm16_vm0, %v15_v1, 0.0  ;;  %v91_v30 = vld [vmem:[%s148_s1] ss:$0 sm:$0xff] }
   0x3   :  { %18 = vadd.xlane.f32.xlu0 %v17_v2  ;;  %v92_v33 = vld [vmem:[%s149_s2] ss:$0 sm:$0xff] }
   0x7   :  { %21 = vadd.xlane.f32.xlu0 %v20_v3 }
  0x90   :  { %v19_v4 = vpop.xlane.xlu0 %18 }
  0x91   :  { %v24_v5 = vmul.f32 0.03125, %v19_v4 }
  0x93   :  { %v26_v6 = vsub.f32 %v14_v0, %v24_v5 }
  0x94   :  { %v22_v7 = vpop.xlane.xlu0 %21 }
  0x95   :  { %v25_v8 = vmul.f32 0.03125, %v22_v7  ;;  %v28_v9 = vmul.f32 %v26_v6, %v26_v6  ;;  %v63_v31 = vmul.f32 %v91_v30, %v26_v6 }
  0x97   :  { %v27_v10 = vsub.f32 %v15_v1, %v25_v8  ;;  %v30_v11 = vsel %vm16_vm0, %v28_v9, 0.0 }
  0x98   :  { %31 = vadd.xlane.f32.xlu1 %v30_v11 }
  0x99   :  { %v29_v12 = vmul.f32 %v27_v10, %v27_v10  ;;  %v64_v35 = vmul.f32 %v91_v30, %v27_v10 }
  0x9b   :  { %v33_v13 = vsel %vm16_vm0, %v29_v12, 0.0 }
  0x9c   :  { %34 = vadd.xlane.f32.xlu1 %v33_v13 }
 0x125   :  { %v32_v14 = vpop.xlane.xlu1 %31 }
 0x126   :  { %v36_v15 = vmul.f32 0.032258064, %v32_v14 }
 0x128   :  { %97 = vrsqrt.f32 %v36_v15  ;;  %vm40_vm1 = vcmp.eq.f32.partialorder %v36_v15, inf  ;;  %v43_v20 = vand.u32 2147483648, %v36_v15  ;;  %vm42_vm2 = vcmp.eq.f32.partialorder %v36_v15, 0.0 }
 0x129   :  { %v35_v16 = vpop.xlane.xlu1 %34 }
 0x12a   :  { %v37_v17 = vmul.f32 0.032258064, %v35_v16 }
 0x12c   :  { %99 = vrsqrt.f32 %v37_v17  ;;  %vm47_vm3 = vcmp.eq.f32.partialorder %v37_v17, inf  ;;  %v50_v26 = vand.u32 2147483648, %v37_v17  ;;  %vm49_vm4 = vcmp.eq.f32.partialorder %v37_v17, 0.0 }
 0x132   :  { %v98_v18 = vpop.eup %97 }
 0x133   :  { %v39_v19 = vmul.f32 %v98_v18, %v36_v15 }
 0x135   :  { %v41_v21 = vsel %vm40_vm1, %v36_v15, %v39_v19 }
 0x136   :  { %v100_v22 = vpop.eup %99  ;;  %v44_v23 = vsel %vm42_vm2, %v43_v20, %v41_v21 }
 0x137   :  { %v52_v24 = vadd.f32 1e-06, %v44_v23  ;;  %v46_v25 = vmul.f32 %v100_v22, %v37_v17 }
 0x139   :  { %101 = vrcp.f32 %v52_v24  ;;  %v48_v27 = vsel %vm47_vm3, %v37_v17, %v46_v25 }
 0x13a   :  { %v51_v28 = vsel %vm49_vm4, %v50_v26, %v48_v27 }
 0x13b   :  { %v53_v29 = vadd.f32 1e-06, %v51_v28 }
 0x13d   :  { %103 = vrcp.f32 %v53_v29 }
 0x143   :  { %v102_v32 = vpop.eup %101 }
 0x144   :  { %v65_v34 = vmul.f32 %v102_v32, %v63_v31 }
 0x146   :  { %v74_v36 = vadd.f32 %v92_v33, %v65_v34 }
 0x147   :  { %v104_v37 = vpop.eup %103 }
 0x148   :  { %v95_v38 = vpack.c.bf16 %v74_v36, %v74_v36  ;;  %v66_v39 = vmul.f32 %v104_v37, %v64_v35 }
 0x14a   :  { %85 = vst.msk [vmem:[%s150_s3] sm:$0xf] %vm84_vm5, %v95_v38  ;;  %v75_v40 = vadd.f32 %v92_v33, %v66_v39 }
 0x14c   :  { %v96_v41 = vpack.c.bf16 %v75_v40, %v75_v40 }
 0x14e   :  { %86 = vst.msk [vmem:[%s150_s3 + $0x4] sm:$0xf] %vm84_vm5, %v96_v41 }

// kernel: bert_forward.16
= control target key start
LH: loop header
LB: loop body
LE: loop exit
PB: predicated region body
PF: predicated region fallthrough
CT: control target
= control target key end

     0   :  { %vm19_vm0 = vcmask 523264   ;;  %v151_v0 = vmov 0.0   ;;  %vm152_vm1 = vmmov 0   ;;  %vm47_vm2 = vcmask 261120   ;;  %s195_s1 = inlined_call_operand.vmem [shape: bf16[32,64], index: 1, kind: input, shape index: {}]   ;;  %s196_s0 = inlined_call_operand.vmem [shape: bf16[16,32], index: 0, kind: input, shape index: {}]   ;;  %s197_s2 = inlined_call_operand.vmem [shape: f32[1,64], index: 2, kind: input, shape index: {}]   ;;  %s198_s3 = inlined_call_operand.vmem [shape: bf16[16,64], index: 3, kind: output, shape index: {}]  }
   0x1   :  { %138 = vmatprep.subr.bf16.mxu0 %v151_v0  ;;  %v148_v1 = vld [vmem:[%s195_s1] sm:$0xff]   ;;  %142 = vmatprep.mubr.msk.bf16.mxu0 %vm152_vm1, %v151_v0  ;;  %20 = vst.msk [vmem:[#allocation2] sm:$0xff] %vm19_vm0, %v151_v0  ;;  %21 = vst.msk [vmem:[#allocation2 + $0x8] sm:$0xff] %vm19_vm0, %v151_v0  ;;  %v149_v2 = vld [vmem:[%s195_s1 + $0x8] sm:$0xff]   ;;  %vm119_vm3 = vcmask 519168  }
   0x2   :  { %139 = vmatpush3.bf16.msra.mxu0 %v148_v1  ;;  %v150_v3 = vld [vmem:[%s196_s0] sm:$0xff]  }
   0x3   :  { %140 = vmatprep.subr.bf16.mxu0 %v151_v0  ;;  %v130_v12 = vld [vmem:[%s197_s2] ss:$0 sm:$0xff] }
   0x6   :  { %141 = vmatpush3.bf16.msra.mxu0 %v149_v2 }
   0x8   :  { %v22_v4 = vld [vmem:[#allocation2] sm:$0xff]  ;;  %v23_v6 = vld [vmem:[#allocation2 + $0x8] sm:$0xff] }
   0x9   :  { %143 = vmatmul.mubr.msk.bf16.vlgmr.msra.gmra.mrb[0].mxu0 %vm47_vm2, %v150_v3 }
  0xdc   :  { %v85_v5 = vpop.f32.mrb[0].mxu0 }
  0xdd   :  { %v92_v7 = vadd.f32 %v85_v5, %v22_v4  ;;  %v144_v8 = vpop.f32.mrb[1].mxu0 }
  0xde   :  { %v88_v9 = vpop.f32.mrb[2].mxu0 }
  0xdf   :  { %95 = vst.msk [vmem:[#allocation2] sm:$0xff] %vm19_vm0, %v92_v7  ;;  %v93_v10 = vadd.f32 %v88_v9, %v23_v6  ;;  %v145_v11 = vpop.f32.mrb[3].mxu0 }
  0xe1   :  { %96 = vst.msk [vmem:[#allocation2 + $0x8] sm:$0xff] %vm19_vm0, %v93_v10 }
  0xe6   :  { %v100_v13 = vld [vmem:[#allocation2] sm:$0xff] }
  0xe7   :  { %v109_v14 = vadd.f32 %v130_v12, %v100_v13 }
  0xe8   :  { %v101_v15 = vld [vmem:[#allocation2 + $0x8] sm:$0xff] }
  0xe9   :  { %v133_v16 = vpack.c.bf16 %v109_v14, %v109_v14  ;;  %v110_v17 = vadd.f32 %v130_v12, %v101_v15 }
  0xeb   :  { %120 = vst.msk [vmem:[%s198_s3] sm:$0xf] %vm119_vm3, %v133_v16  ;;  %v134_v18 = vpack.c.bf16 %v110_v17, %v110_v17 }
  0xed   :  { %121 = vst.msk [vmem:[%s198_s3 + $0x4] sm:$0xf] %vm119_vm3, %v134_v18 }

// kernel: bert_forward.15
= control target key start
LH: loop header
LB: loop body
LE: loop exit
PB: predicated region body
PF: predicated region fallthrough
CT: control target
= control target key end

     0   :  { %vm19_vm0 = vcmask 261120   ;;  %v150_v0 = vmov 0.0   ;;  %vm151_vm1 = vmmov 0   ;;  %vm118_vm2 = vcmask 257024   ;;  %s195_s1 = inlined_call_operand.vmem [shape: bf16[32,32], index: 1, kind: input, shape index: {}]   ;;  %s196_s0 = inlined_call_operand.vmem [shape: bf16[16,32], index: 0, kind: input, shape index: {}]   ;;  %s197_s2 = inlined_call_operand.vmem [shape: f32[1,32], index: 2, kind: input, shape index: {}]   ;;  %s198_s3 = inlined_call_operand.vmem [shape: bf16[16,32], index: 3, kind: output, shape index: {}]  }
   0x1   :  { %137 = vmatprep.subr.bf16.mxu0 %v150_v0  ;;  %v147_v1 = vld [vmem:[%s195_s1] sm:$0xff]   ;;  %141 = vmatprep.mubr.msk.bf16.mxu0 %vm151_vm1, %v150_v0  ;;  %20 = vst.msk [vmem:[#allocation2] sm:$0xff] %vm19_vm0, %v150_v0  ;;  %21 = vst.msk [vmem:[#allocation2 + $0x8] sm:$0xff] %vm19_vm0, %v150_v0  ;;  %v148_v2 = vld [vmem:[%s195_s1 + $0x8] sm:$0xff]  }
   0x2   :  { %138 = vmatpush3.bf16.msra.mxu0 %v147_v1  ;;  %v149_v3 = vld [vmem:[%s196_s0] sm:$0xff]  }
   0x3   :  { %139 = vmatprep.subr.bf16.mxu0 %v150_v0  ;;  %v129_v12 = vld [vmem:[%s197_s2] ss:$0 sm:$0xff] }
   0x6   :  { %140 = vmatpush3.bf16.msra.mxu0 %v148_v2 }
   0x8   :  { %v22_v4 = vld [vmem:[#allocation2] sm:$0xff]  ;;  %v23_v6 = vld [vmem:[#allocation2 + $0x8] sm:$0xff] }
   0x9   :  { %142 = vmatmul.mubr.msk.bf16.vlgmr.msra.gmra.mrb[0].mxu0 %vm19_vm0, %v149_v3 }
  0xdc   :  { %v85_v5 = vpop.f32.mrb[0].mxu0 }
  0xdd   :  { %v92_v7 = vadd.f32 %v85_v5, %v22_v4  ;;  %v143_v8 = vpop.f32.mrb[1].mxu0 }
  0xde   :  { %v88_v9 = vpop.f32.mrb[2].mxu0 }
  0xdf   :  { %94 = vst.msk [vmem:[#allocation2] sm:$0xff] %vm19_vm0, %v92_v7  ;;  %v93_v10 = vadd.f32 %v88_v9, %v23_v6  ;;  %v144_v11 = vpop.f32.mrb[3].mxu0 }
  0xe1   :  { %95 = vst.msk [vmem:[#allocation2 + $0x8] sm:$0xff] %vm19_vm0, %v93_v10 }
  0xe6   :  { %v99_v13 = vld [vmem:[#allocation2] sm:$0xff] }
  0xe7   :  { %v108_v14 = vadd.f32 %v129_v12, %v99_v13 }
  0xe8   :  { %v100_v15 = vld [vmem:[#allocation2 + $0x8] sm:$0xff] }
  0xe9   :  { %v132_v16 = vpack.c.bf16 %v108_v14, %v108_v14  ;;  %v109_v17 = vadd.f32 %v129_v12, %v100_v15 }
  0xeb   :  { %119 = vst.msk [vmem:[%s198_s3] sm:$0xf] %vm118_vm2, %v132_v16  ;;  %v133_v18 = vpack.c.bf16 %v109_v17, %v109_v17 }
  0xed   :  { %120 = vst.msk [vmem:[%s198_s3 + $0x4] sm:$0xf] %vm118_vm2, %v133_v18 }

// kernel: bert_forward.18
= control target key start
LH: loop header
LB: loop body
LE: loop exit
PB: predicated region body
PF: predicated region fallthrough
CT: control target
= control target key end

     0   :  { %vm22_vm0 = vcmask 261120   ;;  %v144_v0 = vmov 0.0   ;;  %vm145_vm1 = vmmov 0   ;;  %s202_s1 = inlined_call_operand.vmem [shape: bf16[32,32], index: 1, kind: input, shape index: {}]   ;;  %s203_s0 = inlined_call_operand.vmem [shape: bf16[16,32], index: 0, kind: input, shape index: {}]   ;;  %s204_s2 = inlined_call_operand.vmem [shape: f32[1,32], index: 2, kind: input, shape index: {}]   ;;  %s205_s3 = inlined_call_operand.vmem [shape: f32[16,32], index: 3, kind: input, shape index: {}]   ;;  %s206_s4 = inlined_call_operand.vmem [shape: f32[16,32], index: 4, kind: output, shape index: {}]  }
   0x1   :  { %131 = vmatprep.subr.bf16.mxu0 %v144_v0  ;;  %v141_v1 = vld [vmem:[%s202_s1] sm:$0xff]   ;;  %135 = vmatprep.mubr.msk.bf16.mxu0 %vm145_vm1, %v144_v0  ;;  %23 = vst.msk [vmem:[#allocation2] sm:$0xff] %vm22_vm0, %v144_v0  ;;  %24 = vst.msk [vmem:[#allocation2 + $0x8] sm:$0xff] %vm22_vm0, %v144_v0  ;;  %v142_v2 = vld [vmem:[%s202_s1 + $0x8] sm:$0xff]  }
   0x2   :  { %132 = vmatpush3.bf16.msra.mxu0 %v141_v1  ;;  %v143_v3 = vld [vmem:[%s203_s0] sm:$0xff]   ;;  %v114_v17 = vld [vmem:[%s205_s3 + $0x8] sm:$0xff] }
   0x3   :  { %133 = vmatprep.subr.bf16.mxu0 %v144_v0  ;;  %v127_v12 = vld [vmem:[%s204_s2] ss:$0 sm:$0xff] }
   0x4   :  { %v113_v14 = vld [vmem:[%s205_s3] sm:$0xff] }
   0x6   :  { %134 = vmatpush3.bf16.msra.mxu0 %v142_v2 }
   0x8   :  { %v25_v4 = vld [vmem:[#allocation2] sm:$0xff]  ;;  %v26_v6 = vld [vmem:[#allocation2 + $0x8] sm:$0xff] }
   0x9   :  { %136 = vmatmul.mubr.msk.bf16.vlgmr.msra.gmra.mrb[0].mxu0 %vm22_vm0, %v143_v3 }
  0xdc   :  { %v88_v5 = vpop.f32.mrb[0].mxu0 }
  0xdd   :  { %v95_v7 = vadd.f32 %v88_v5, %v25_v4  ;;  %v137_v8 = vpop.f32.mrb[1].mxu0 }
  0xde   :  { %v91_v9 = vpop.f32.mrb[2].mxu0 }
  0xdf   :  { %97 = vst.msk [vmem:[#allocation2] sm:$0xff] %vm22_vm0, %v95_v7  ;;  %v96_v10 = vadd.f32 %v91_v9, %v26_v6  ;;  %v138_v11 = vpop.f32.mrb[3].mxu0 }
  0xe1   :  { %98 = vst.msk [vmem:[#allocation2 + $0x8] sm:$0xff] %vm22_vm0, %v96_v10 }
  0xe6   :  { %v102_v13 = vld [vmem:[#allocation2] sm:$0xff] }
  0xe7   :  { %v111_v15 = vadd.f32 %v127_v12, %v102_v13 }
  0xe8   :  { %v103_v16 = vld [vmem:[#allocation2 + $0x8] sm:$0xff] }
  0xe9   :  { %v115_v18 = vadd.f32 %v113_v14, %v111_v15  ;;  %v112_v19 = vadd.f32 %v127_v12, %v103_v16 }
  0xeb   :  { %117 = vst.msk [vmem:[%s206_s4] sm:$0xff] %vm22_vm0, %v115_v18  ;;  %v116_v20 = vadd.f32 %v114_v17, %v112_v19 }
  0xed   :  { %118 = vst.msk [vmem:[%s206_s4 + $0x8] sm:$0xff] %vm22_vm0, %v116_v20 }

// kernel: bert_forward.20
= control target key start
LH: loop header
LB: loop body
LE: loop exit
PB: predicated region body
PF: predicated region fallthrough
CT: control target
= control target key end

     0   :  { %vm28_vm0 = vcmask 261120   ;;  %v323_v0 = vmov 0.0   ;;  %vm324_vm1 = vmmov 0   ;;  %s418_s1 = inlined_call_operand.vmem [shape: bf16[32,128], index: 1, kind: input, shape index: {}]   ;;  %s419_s3 = inlined_call_operand.vmem [shape: bf16[128,32], index: 3, kind: input, shape index: {}]   ;;  %s420_s0 = inlined_call_operand.vmem [shape: bf16[16,32], index: 0, kind: input, shape index: {}]   ;;  %s421_s2 = inlined_call_operand.vmem [shape: f32[1,128], index: 2, kind: input, shape index: {}]   ;;  %s422_s4 = inlined_call_operand.vmem [shape: f32[1,32], index: 4, kind: input, shape index: {}]   ;;  %s423_s5 = inlined_call_operand.vmem [shape: f32[16,32], index: 5, kind: input, shape index: {}]   ;;  %s424_s6 = inlined_call_operand.vmem [shape: f32[16,32], index: 6, kind: output, shape index: {}]  }
   0x1   :  { %278 = vmatprep.subr.bf16.mxu0 %v323_v0  ;;  %v308_v1 = vld [vmem:[%s418_s1] sm:$0xff]   ;;  %282 = vmatprep.mubr.msk.bf16.mxu0 %vm324_vm1, %v323_v0  ;;  %29 = vst.msk [vmem:[#allocation2] sm:$0xff] %vm28_vm0, %v323_v0  ;;  %30 = vst.msk [vmem:[#allocation2 + $0x8] sm:$0xff] %vm28_vm0, %v323_v0  ;;  %v309_v2 = vld [vmem:[%s418_s1 + $0x8] sm:$0xff]  }
   0x2   :  { %286 = vmatprep.subr.bf16.mxu1 %v323_v0  ;;  %302 = vmatprep.mubr.msk.bf16.mxu1 %vm324_vm1, %v323_v0  ;;  %v311_v3 = vld [vmem:[%s419_s3] sm:$0xff]   ;;  %v312_v5 = vld [vmem:[%s419_s3 + $0x8] sm:$0xff]   ;;  %v313_v6 = vld [vmem:[%s419_s3 + $0x10] sm:$0xff]  }
   0x3   :  { %279 = vmatpush3.bf16.msra.mxu0 %v308_v1  ;;  %v310_v4 = vld [vmem:[%s420_s0] sm:$0xff]   ;;  %287 = vmatpush3.bf16.msra.mxu1 %v311_v3  ;;  %v314_v7 = vld [vmem:[%s419_s3 + $0x18] sm:$0xff]   ;;  %v316_v9 = vld [vmem:[%s419_s3 + $0x28] sm:$0xff]  }
   0x4   :  { %280 = vmatprep.subr.bf16.mxu0 %v323_v0  ;;  %288 = vmatprep.subr.bf16.mxu1 %v323_v0  ;;  %v315_v8 = vld [vmem:[%s419_s3 + $0x20] sm:$0xff]   ;;  %v317_v10 = vld [vmem:[%s419_s3 + $0x30] sm:$0xff]   ;;  %v318_v11 = vld [vmem:[%s419_s3 + $0x38] sm:$0xff]  }
   0x5   :  { %v252_v12 = vld [vmem:[%s421_s2] ss:$0 sm:$0xff]  ;;  %v243_v43 = vld [vmem:[%s423_s5 + $0x8] sm:$0xff] }
   0x6   :  { %v265_v38 = vld [vmem:[%s422_s4] ss:$0 sm:$0xff] }
   0x7   :  { %281 = vmatpush3.bf16.msra.mxu0 %v309_v2  ;;  %289 = vmatpush3.bf16.msra.mxu1 %v312_v5  ;;  %v242_v40 = vld [vmem:[%s423_s5] sm:$0xff] }
   0x8   :  { %290 = vmatprep.subr.bf16.mxu1 %v323_v0  ;;  %v116_v30 = vld [vmem:[#allocation2] sm:$0xff]  ;;  %v117_v32 = vld [vmem:[#allocation2 + $0x8] sm:$0xff] }
   0xa   :  { %283 = vmatmul.mubr.msk.bf16.vlgmr.msra.gmra.mrb[0].mxu0 %vm28_vm0, %v310_v4 }
   0xb   :  { %291 = vmatpush3.bf16.msra.mxu1 %v313_v6 }
   0xc   :  { %292 = vmatprep.subr.bf16.mxu1 %v323_v0 }
   0xf   :  { %293 = vmatpush3.bf16.msra.mxu1 %v314_v7 }
  0x10   :  { %294 = vmatprep.subr.bf16.mxu1 %v323_v0 }
  0x13   :  { %295 = vmatpush3.bf16.msra.mxu1 %v315_v8 }
  0x14   :  { %296 = vmatprep.subr.bf16.mxu1 %v323_v0 }
  0x17   :  { %297 = vmatpush3.bf16.msra.mxu1 %v316_v9 }
  0x18   :  { %298 = vmatprep.subr.bf16.mxu1 %v323_v0 }
  0x1b   :  { %299 = vmatpush3.bf16.msra.mxu1 %v317_v10 }
  0x1c   :  { %300 = vmatprep.subr.bf16.mxu1 %v323_v0 }
  0x1f   :  { %301 = vmatpush3.bf16.msra.mxu1 %v318_v11 }
  0xdd   :  { %v99_v13 = vpop.f32.mrb[0].mxu0 }
  0xde   :  { %v100_v14 = vadd.f32 %v252_v12, %v99_v13  ;;  %v284_v15 = vpop.f32.mrb[1].mxu0 }
  0xdf   :  { %v102_v16 = vpop.f32.mrb[2].mxu0 }
  0xe0   :  { %v108_v17 = vmul.f32 0.70710677, %v100_v14  ;;  %v103_v18 = vadd.f32 %v252_v12, %v102_v16  ;;  %v285_v19 = vpop.f32.mrb[3].mxu0  ;;  %v106_v24 = vmul.f32 0.5, %v100_v14 }
  0xe2   :  { %319 = verf.f32 %v108_v17  ;;  %v109_v20 = vmul.f32 0.70710677, %v103_v18  ;;  %v107_v25 = vmul.f32 0.5, %v103_v18 }
  0xe4   :  { %321 = verf.f32 %v109_v20 }
  0xec   :  { %v320_v21 = vpop.eup %319 }
  0xed   :  { %v112_v22 = vadd.f32 1.0, %v320_v21 }
  0xee   :  { %v322_v23 = vpop.eup %321 }
  0xef   :  { %v113_v26 = vadd.f32 1.0, %v322_v23  ;;  %v114_v27 = vmul.f32 %v112_v22, %v106_v24 }
  0xf1   :  { %v115_v28 = vmul.f32 %v113_v26, %v107_v25 }
  0xf3   :  { %v118_v29 = vpack.c.bf16 %v115_v28, %v114_v27 }
  0xf5   :  { %303 = vmatmul.mubr.bf16.vlgmr.msra.gmra.mrb[0].mxu1 %v118_v29 }
 0x1c8   :  { %v217_v31 = vpop.f32.mrb[0].mxu1 }
 0x1c9   :  { %v224_v33 = vadd.f32 %v217_v31, %v116_v30  ;;  %v304_v34 = vpop.f32.mrb[1].mxu1 }
 0x1ca   :  { %v220_v35 = vpop.f32.mrb[2].mxu1 }
 0x1cb   :  { %226 = vst.msk [vmem:[#allocation2] sm:$0xff] %vm28_vm0, %v224_v33  ;;  %v225_v36 = vadd.f32 %v220_v35, %v117_v32  ;;  %v305_v37 = vpop.f32.mrb[3].mxu1 }
 0x1cd   :  { %227 = vst.msk [vmem:[#allocation2 + $0x8] sm:$0xff] %vm28_vm0, %v225_v36 }
 0x1d2   :  { %v231_v39 = vld [vmem:[#allocation2] sm:$0xff] }
 0x1d3   :  { %v240_v41 = vadd.f32 %v265_v38, %v231_v39 }
 0x1d4   :  { %v232_v42 = vld [vmem:[#allocation2 + $0x8] sm:$0xff] }
 0x1d5   :  { %v244_v44 = vadd.f32 %v242_v40, %v240_v41  ;;  %v241_v45 = vadd.f32 %v265_v38, %v232_v42 }
 0x1d7   :  { %246 = vst.msk [vmem:[%s424_s6] sm:$0xff] %vm28_vm0, %v244_v44  ;;  %v245_v46 = vadd.f32 %v243_v43, %v241_v45 }
 0x1d9   :  { %247 = vst.msk [vmem:[%s424_s6 + $0x8] sm:$0xff] %vm28_vm0, %v245_v46 }

// kernel: bert_forward.17
= control target key start
LH: loop header
LB: loop body
LE: loop exit
PB: predicated region body
PF: predicated region fallthrough
CT: control target
= control target key end

     0   :  { %s1222_s12 = smov 0   ;;  %s1224_s13 = smov 0   ;;  %s1404_s0 = inlined_call_operand.vmem [shape: bf16[2,8,32], index: 0, kind: input, shape index: {}]   ;;  %s1405_s1 = inlined_call_operand.vmem [shape: bf16[2,8,64], index: 1, kind: input, shape index: {}]   ;;  %s1406_s2 = inlined_call_operand.vmem [shape: f32[2,1,8], index: 2, kind: input, shape index: {}]   ;;  %s1407_s3 = inlined_call_operand.vmem [shape: bf16[2,8,32], index: 3, kind: output, shape index: {}]  }
   0x1   :  { %s1226_s14 = smov 0  }
   0x2 LB: > { %s32_s15 = sadd.s32 1, %s1182_s13  ;;  %p1013_p0 = scmp.ge.s32.totalorder %s1186_s14, 1  ;;  %s1186_s14 = sphi %s1226_s14, %s13_s14   ;;  %s1182_s13 = sphi %s1224_s13, %s1409_s13   ;;  %s1178_s12 = sphi %s1222_s12, %s1408_s12  }
   0x3   : > { %p34_p1 = scmp.ge.s32.totalorder %s32_s15, 2  ;;  %p189_p2 = scmp.lt.s32.totalorder %s1186_s14, 3 }
   0x5   : > { %s1411_s15 = smov (%p34_p1, %s32_s15), 0  ;;  %p190_p3 = pnand %p1013_p0, %p189_p2 }
   0x6   : > { %p230_p4 = scmp.lt.s32.totalorder (!%p190_p3), %s1178_s12, 1  ;;  %vm271_vm0 = vcmask (!%p190_p3), 64512   ;;  %v1188_v0 = vmov (!%p190_p3), 0.0   ;;  %vm1189_vm1 = vmmov (!%p190_p3), 0   ;;  %v1190_v4 = vmov (!%p190_p3), 0   ;;  %s1192_s26 = smov (!%p190_p3), 96  }
   0x7   : > { %193 = sbr.rel (%p190_p3) target bundleno = 1470 (0x5be), region = 32  ;;  %1051 = vmatprep.subr.bf16.mxu0 (!%p190_p3), %v1188_v0  ;;  %272 = vst.msk [vmem:[#allocation4] sm:$0xff] (!%p190_p3), %vm271_vm0, %v1188_v0  ;;  %273 = vst.msk [vmem:[#allocation4 + $0x8] sm:$0xff] (!%p190_p3), %vm271_vm0, %v1188_v0  ;;  %1053 = vmatprep.mubr.msk.bf16.mxu0 (!%p190_p3), %vm1189_vm1, %v1188_v0  ;;  %vm262_vm2 = vcmask (!%p190_p3), 7168   ;;  %v1191_v5 = vmov (!%p190_p3), -inf   ;;  %v329_v6 = vlaneseq (!%p190_p3)  ;;  %s1193_s27 = smov (!%p190_p3), 120  }
   0x8   : > { %274 = vst.msk [vmem:[#allocation4 + $0x10] sm:$0xff] (!%p190_p3), %vm271_vm0, %v1188_v0  ;;  %275 = vst.msk [vmem:[#allocation4 + $0x18] sm:$0xff] (!%p190_p3), %vm271_vm0, %v1188_v0  ;;  %1057 = vmatprep.subr.bf16.mxu1 (!%p190_p3), %v1188_v0  ;;  %1059 = vmatprep.mubr.msk.bf16.mxu1 (!%p190_p3), %vm1189_vm1, %v1188_v0  ;;  %s1194_s28 = smov (!%p190_p3), 112   ;;  %s1195_s29 = smov (!%p190_p3), 104   ;;  %vm375_vm5 = vcmask (!%p190_p3), 1043456   ;;  %vm849_vm6 = vcmask (!%p190_p3), 60416  }
   0x9   : > { %1137 = vset.pattern.permute.xlu0 (!%p190_p3), %v1190_v4  ;;  %1138 = vset.pattern.permute.xlu1 (!%p190_p3), %v1190_v4  ;;  %263 = vst.msk [vmem:[#allocation2] sm:$0xff] (!%p190_p3), %vm262_vm2, %v1191_v5  ;;  %264 = vst.msk [vmem:[#allocation2 + $0x8] sm:$0xff] (!%p190_p3), %vm262_vm2, %v1191_v5  ;;  %v330_v8 = vshrl.u32 (!%p190_p3), %v329_v6, 7  ;;  %s1196_s30 = smov (!%p190_p3), 88   ;;  %s1197_s4 = smov (!%p190_p3), 80   ;;  %vm867_vm7 = vcmask (!%p190_p3), 126016  }
   0xa   : > { %265 = vst.msk [vmem:[#allocation2 + $0x10] sm:$0xff] (!%p190_p3), %vm262_vm2, %v1191_v5  ;;  %266 = vst.msk [vmem:[#allocation2 + $0x18] sm:$0xff] (!%p190_p3), %vm262_vm2, %v1191_v5  ;;  %s1198_s5 = smov (!%p190_p3), 72   ;;  %s1199_s9 = smov (!%p190_p3), 8   ;;  %vm885_vm8 = vcmask (!%p190_p3), 191616   ;;  %vm903_vm9 = vcmask (!%p190_p3), 257216  }
   0xb   : > { %267 = vst.msk [vmem:[#allocation3] sm:$0xff] (!%p190_p3), %vm262_vm2, %v1188_v0  ;;  %268 = vst.msk [vmem:[#allocation3 + $0x8] sm:$0xff] (!%p190_p3), %vm262_vm2, %v1188_v0  ;;  %v331_v9 = vsub.s32 (!%p190_p3), 0, %v330_v8  ;;  %s1200_s10 = smov (!%p190_p3), 16   ;;  %s1201_s11 = smov (!%p190_p3), 24  }
   0xc   : > { %269 = vst.msk [vmem:[#allocation3 + $0x10] sm:$0xff] (!%p190_p3), %vm262_vm2, %v1188_v0  ;;  %270 = vst.msk [vmem:[#allocation3 + $0x18] sm:$0xff] (!%p190_p3), %vm262_vm2, %v1188_v0 }
   0xe   : > { %s1413_s12 = smov (!%p230_p4, %s1178_s12), 1 }
   0xf   : > { %s1254_s16 = sshll.u32 %s1413_s12, 2  ;;  %s249_s25 = scalar_lea.vmem %s1406_s2, %s1413_s12 }
  0x10   : > { %s243_s19 = scalar_lea.vmem %s1405_s1, %s1254_s16  ;;  %s236_s22 = scalar_lea.vmem %s1404_s0, %s1254_s16  ;;  %v278_v7 = vld [vmem:[%s249_s25] sm:$0x1] }
  0x11   : > { %v277_v1 = vld [vmem:[%s243_s19] sm:$0xf]  ;;  %vm327_vm3 = vcmp.eq.f32.partialorder %v278_v7, 0.0  ;;  %v615_v7 = vld [vmem:[#allocation2 + $0x10] sm:$0xff]  ;;  %s1386_s8 = scalar_lea.vmem %s1407_s3, %s1254_s16 }
  0x12   : > { %v284_v2 = vsel %vm271_vm0, %v277_v1, 0  ;;  %v276_v3 = vld [vmem:[%s236_s22] sm:$0xf]  ;;  %v328_v10 = vsel %vm327_vm3, 1, %v1190_v4  ;;  %v1290_v19 = vcombine.low %v277_v1, %v277_v1 }
  0x13   : > { %1052 = vmatpush3.bf16.xpose.msra.mxu0 %v284_v2  ;;  %v1284_v11 = vrot.slane %v328_v10, %v331_v9  ;;  %v1020_v20 = vcombine.low %v276_v3, %v276_v3  ;;  %v1296_v21 = vld [vmem:[#allocation2] sm:$0xff] }
  0x14   : > { %1069 = vmatprep.subr.bf16.mxu0 %v1188_v0  ;;  %370 = vrot.lane.b32.xlu1 %v1290_v19, %s1192_s26 }
  0x15   : > { %vm333_vm4 = vcmp.eq.s32.totalorder %v1284_v11, 1  ;;  %v752_v11 = vld [vmem:[#allocation2 + $0x18] sm:$0xff] }
  0x18   : > { %427 = vrot.lane.b32.xlu1 %v1290_v19, %s1193_s27 }
  0x1a   : > { %1054 = vmatmul.mubr.msk.bf16.vlgmr.msra.gmra.mrb[0].mxu0 %vm271_vm0, %v276_v3  ;;  %v1338_v3 = vld [vmem:[#allocation2 + $0x8] sm:$0xff] }
  0x1b   : > { %1071 = vmatprep.mubr.msk.bf16.mxu0 %vm1189_vm1, %v1188_v0 }
  0x1c   : > { %425 = vrot.lane.b32.xlu1 %v1020_v20, %s1193_s27 }
  0x20   : > { %564 = vrot.lane.b32.xlu1 %v1290_v19, %s1194_s28 }
  0x24   : > { %562 = vrot.lane.b32.xlu1 %v1020_v20, %s1194_s28 }
  0x28   : > { %701 = vrot.lane.b32.xlu1 %v1290_v19, %s1195_s29 }
  0x2c   : > { %699 = vrot.lane.b32.xlu1 %v1020_v20, %s1195_s29 }
  0x86   : > { %v371_v25 = vpop.permute.xlu1 %370 }
  0x87   : > { %v377_v26 = vsel %vm375_vm5, %v371_v25, 0 }
  0x88   : > { %1058 = vmatpush3.bf16.msra.mxu1 %v377_v26 }
  0x89   : > { %1063 = vmatprep.subr.bf16.mxu1 %v1188_v0 }
  0x8a   : > { %v428_v30 = vpop.permute.xlu1 %427 }
  0x8b   : > { %v433_v33 = vsel %vm271_vm0, %v428_v30, 0 }
  0x8e   : > { %v426_v31 = vpop.permute.xlu1 %425 }
  0x92   : > { %v565_v35 = vpop.permute.xlu1 %564 }
  0x93   : > { %v570_v37 = vsel %vm271_vm0, %v565_v35, 0 }
  0x96   : > { %v563_v36 = vpop.permute.xlu1 %562 }
  0x9a   : > { %v702_v38 = vpop.permute.xlu1 %701 }
  0x9b   : > { %v707_v39 = vsel %vm271_vm0, %v702_v38, 0 }
  0x9e   : > { %v700_v40 = vpop.permute.xlu1 %699 }
  0xed   : > { %v320_v12 = vpop.f32.mrb[0].mxu0 }
  0xee   : > { %v326_v13 = vmul.f32 0.35355338, %v320_v12  ;;  %v1055_v14 = vpop.f32.mrb[1].mxu0 }
  0xef   : > { %v323_v15 = vpop.f32.mrb[2].mxu0 }
  0xf0   : > { %v1056_v16 = vpop.f32.mrb[3].mxu0  ;;  %v334_v17 = vsel %vm333_vm4, -1e+09, %v326_v13 }
  0xf1   : > { %v336_v18 = vsel %vm271_vm0, %v334_v17, -inf }
  0xf2   : > { %337 = vmax.xlane.f32.xlu0 %v336_v18 }
 0x17f   : > { %v338_v22 = vpop.xlane.xlu0 %337 }
 0x180   : > { %v1299_v23 = vmax.f32 %v1296_v21, %v338_v22 }
 0x182   : > { %v340_v24 = vsub.f32 %v1296_v21, %v1299_v23  ;;  %421 = vst.msk [vmem:[#allocation2] sm:$0xff] %vm262_vm2, %v1299_v23  ;;  %345 = vperm.xlu0 %1137, %v1299_v23  }
 0x201   : > { %v346_v27 = vpop.permute.xlu0 %345 }
 0x202   : > { %v348_v28 = vsub.f32 %v334_v17, %v346_v27 }
 0x204   : > { %v349_v29 = vmul.f32 1.442695, %v348_v28 }
 0x206   : > { %1140 = vpow2.f32 %v349_v29 }
 0x210   : > { %v1308_v32 = vpop.eup %1140 }
 0x211   : > { %v366_v34 = vpack.c.bf16 %v1308_v32, %v1308_v32  ;;  %v353_v15 = vsel %vm271_vm0, %v1308_v32, 0.0 }
 0x213   : > { %1060 = vmatmul.mubr.msk.bf16.vlgmr.msra.gmra.mrb[0].mxu1 %vm271_vm0, %v366_v34 }
 0x214   : > { %1064 = vmatpush3.bf16.xpose.msra.mxu1 %v433_v33  ;;  %1065 = vmatprep.mubr.msk.bf16.mxu1 %vm1189_vm1, %v1188_v0 }
 0x215   : > { %1075 = vmatprep.subr.bf16.mxu1 %v1188_v0 }
 0x21b   : > { %1066 = vmatmul.mubr.msk.bf16.vlgmr.msra.gmra.mrb[4].mxu1 %vm271_vm0, %v426_v31 }
 0x21c   : > { %1076 = vmatpush3.bf16.xpose.msra.mxu1 %v570_v37  ;;  %1077 = vmatprep.mubr.msk.bf16.mxu1 %vm1189_vm1, %v1188_v0 }
 0x21d   : > { %1087 = vmatprep.subr.bf16.mxu1 %v1188_v0 }
 0x223   : > { %1078 = vmatmul.mubr.msk.bf16.vlgmr.msra.gmra.mrb[8].mxu1 %vm271_vm0, %v563_v36 }
 0x224   : > { %1088 = vmatpush3.bf16.xpose.msra.mxu1 %v707_v39  ;;  %1089 = vmatprep.mubr.msk.bf16.mxu1 %vm1189_vm1, %v1188_v0 }
 0x22b   : > { %1090 = vmatmul.mubr.msk.bf16.vlgmr.msra.gmra.mrb[12].mxu1 %vm271_vm0, %v700_v40 }
 0x2e6   : > { %v1327_v41 = vpop.f32.mrb[0].mxu1 }
 0x2e7   : > { %v1061_v42 = vpop.f32.mrb[1].mxu1 }
 0x2e8   : > { %v416_v43 = vpop.f32.mrb[2].mxu1 }
 0x2e9   : > { %v1062_v44 = vpop.f32.mrb[3].mxu1 }
 0x2ee   : > { %v469_v45 = vpop.f32.mrb[4].mxu1 }
 0x2ef   : > { %v475_v46 = vmul.f32 0.35355338, %v469_v45  ;;  %v1067_v47 = vpop.f32.mrb[5].mxu1 }
 0x2f0   : > { %v472_v48 = vpop.f32.mrb[6].mxu1 }
 0x2f1   : > { %v1068_v49 = vpop.f32.mrb[7].mxu1  ;;  %v476_v50 = vsel %vm333_vm4, -1e+09, %v475_v46  ;;  %v351_v48 = vld [vmem:[#allocation3] sm:$0xff] }
 0x2f2   : > { %v479_v51 = vsel %vm271_vm0, %v476_v50, -inf }
 0x2f3   : > { %480 = vmax.xlane.f32.xlu1 %v479_v51 }
 0x2f6   : > { %v606_v52 = vpop.f32.mrb[8].mxu1 }
 0x2f7   : > { %v612_v53 = vmul.f32 0.35355338, %v606_v52  ;;  %v1079_v54 = vpop.f32.mrb[9].mxu1 }
 0x2f8   : > { %v609_v55 = vpop.f32.mrb[10].mxu1  ;;  %v495_v54 = vld [vmem:[#allocation3 + $0x8] sm:$0xff] }
 0x2f9   : > { %v1080_v56 = vpop.f32.mrb[11].mxu1  ;;  %v613_v57 = vsel %vm333_vm4, -1e+09, %v612_v53 }
 0x2fa   : > { %v616_v58 = vsel %vm271_vm0, %v613_v57, -inf }
 0x2fb   : > { %617 = vmax.xlane.f32.xlu0 %v616_v58  ;;  %v359_v58 = vld [vmem:[#allocation4] sm:$0xff] }
 0x2fe   : > { %v743_v59 = vpop.f32.mrb[12].mxu1 }
 0x2ff   : > { %v749_v60 = vmul.f32 0.35355338, %v743_v59  ;;  %v1091_v61 = vpop.f32.mrb[13].mxu1 }
 0x300   : > { %v746_v62 = vpop.f32.mrb[14].mxu1 }
 0x301   : > { %v1092_v63 = vpop.f32.mrb[15].mxu1  ;;  %v750_v1 = vsel %vm333_vm4, -1e+09, %v749_v60  ;;  %v632_v60 = vld [vmem:[#allocation3 + $0x10] sm:$0xff] }
 0x302   : > { %v753_v2 = vsel %vm271_vm0, %v750_v1, -inf }
 0x303   : > { %754 = vmax.xlane.f32.xlu1 %v753_v2 }
 0x380   : > { %v481_v4 = vpop.xlane.xlu1 %480 }
 0x381   : > { %v1341_v5 = vmax.f32 %v1338_v3, %v481_v4  ;;  %v769_v4 = vld [vmem:[#allocation3 + $0x18] sm:$0xff] }
 0x383   : > { %v483_v6 = vsub.f32 %v1338_v3, %v1341_v5  ;;  %561 = vst.msk [vmem:[#allocation2 + $0x8] sm:$0xff] %vm262_vm2, %v1341_v5  ;;  %488 = vperm.xlu1 %1138, %v1341_v5  }
 0x385   : > { %v484_v46 = vmul.f32 1.442695, %v483_v6 }
 0x388   : > { %v618_v8 = vpop.xlane.xlu0 %617 }
 0x389   : > { %v619_v9 = vmax.f32 %v615_v7, %v618_v8 }
 0x38b   : > { %v620_v10 = vsub.f32 %v615_v7, %v619_v9  ;;  %698 = vst.msk [vmem:[#allocation2 + $0x10] sm:$0xff] %vm262_vm2, %v619_v9  ;;  %625 = vperm.xlu0 %1137, %v619_v9  }
 0x38d   : > { %v621_v34 = vmul.f32 1.442695, %v620_v10 }
 0x390   : > { %v755_v12 = vpop.xlane.xlu1 %754 }
 0x391   : > { %v756_v13 = vmax.f32 %v752_v11, %v755_v12 }
 0x393   : > { %v757_v14 = vsub.f32 %v752_v11, %v756_v13  ;;  %835 = vst.msk [vmem:[#allocation2 + $0x18] sm:$0xff] %vm262_vm2, %v756_v13  ;;  %762 = vperm.xlu1 %1138, %v756_v13  }
 0x395   : > { %v758_v23 = vmul.f32 1.442695, %v757_v14 }
 0x397   : > { %511 = vrot.lane.b32.xlu1 %v1290_v19, %s1196_s30 }
 0x39b   : > { %648 = vrot.lane.b32.xlu1 %v1290_v19, %s1197_s4 }
 0x39f   : > { %785 = vrot.lane.b32.xlu1 %v1290_v19, %s1198_s5  ;;  %v341_v19 = vmul.f32 1.442695, %v340_v24 }
 0x3aa   : > { %354 = vadd.xlane.f32.xlu0 %v353_v15 }
 0x402   : > { %v489_v16 = vpop.permute.xlu1 %488 }
 0x403   : > { %v491_v17 = vsub.f32 %v476_v50, %v489_v16 }
 0x405   : > { %v492_v18 = vmul.f32 1.442695, %v491_v17  ;;  %v503_v17 = vld [vmem:[#allocation4 + $0x8] sm:$0xff] }
 0x407   : > { %1142 = vpow2.f32 %v492_v18 }
 0x40a   : > { %v626_v20 = vpop.permute.xlu0 %625 }
 0x40b   : > { %v628_v22 = vsub.f32 %v613_v57, %v626_v20 }
 0x40d   : > { %v629_v25 = vmul.f32 1.442695, %v628_v22 }
 0x40f   : > { %1144 = vpow2.f32 %v629_v25 }
 0x411   : > { %v1143_v26 = vpop.eup %1142 }
 0x412   : > { %v763_v27 = vpop.permute.xlu1 %762  ;;  %v497_v28 = vsel %vm271_vm0, %v1143_v26, 0.0  ;;  %v510_v35 = vpack.c.bf16 %v1143_v26, %v1143_v26 }
 0x413   : > { %v765_v29 = vsub.f32 %v750_v1, %v763_v27  ;;  %498 = vadd.xlane.f32.xlu1 %v497_v28  ;;  %v640_v28 = vld [vmem:[#allocation4 + $0x10] sm:$0xff] }
 0x415   : > { %v766_v30 = vmul.f32 1.442695, %v765_v29 }
 0x416   : > { %v512_v31 = vpop.permute.xlu1 %511 }
 0x417   : > { %1146 = vpow2.f32 %v766_v30  ;;  %v517_v32 = vsel %vm375_vm5, %v512_v31, 0 }
 0x418   : > { %1070 = vmatpush3.bf16.msra.mxu0 %v517_v32  ;;  %1148 = vpow2.f32 %v341_v19 }
 0x419   : > { %v1145_v33 = vpop.eup %1144  ;;  %1081 = vmatprep.subr.bf16.mxu0 %v1188_v0  ;;  %1150 = vpow2.f32 %v621_v34 }
 0x41a   : > { %v634_v36 = vsel %vm271_vm0, %v1145_v33, 0.0  ;;  %v649_v37 = vpop.permute.xlu1 %648  ;;  %1152 = vpow2.f32 %v758_v23  ;;  %v647_v39 = vpack.c.bf16 %v1145_v33, %v1145_v33 }
 0x41b   : > { %1072 = vmatmul.mubr.msk.bf16.vlgmr.msra.gmra.mrb[4].mxu0 %vm271_vm0, %v510_v35  ;;  %635 = vadd.xlane.f32.xlu0 %v634_v36  ;;  %v654_v21 = vsel %vm375_vm5, %v649_v37, 0  ;;  %1154 = vpow2.f32 %v484_v46  ;;  %v777_v35 = vld [vmem:[#allocation4 + $0x18] sm:$0xff] }
 0x41c   : > { %1082 = vmatpush3.bf16.msra.mxu0 %v654_v21  ;;  %1083 = vmatprep.mubr.msk.bf16.mxu0 %vm1189_vm1, %v1188_v0 }
 0x41d   : > { %1093 = vmatprep.subr.bf16.mxu0 %v1188_v0 }
 0x41e   : > { %v786_v24 = vpop.permute.xlu1 %785 }
 0x41f   : > { %v791_v40 = vsel %vm375_vm5, %v786_v24, 0 }
 0x421   : > { %v1147_v38 = vpop.eup %1146 }
 0x422   : > { %v771_v42 = vsel %vm271_vm0, %v1147_v38, 0.0  ;;  %v1149_v43 = vpop.eup %1148  ;;  %v784_v45 = vpack.c.bf16 %v1147_v38, %v1147_v38 }
 0x423   : > { %1084 = vmatmul.mubr.msk.bf16.vlgmr.msra.gmra.mrb[8].mxu0 %vm271_vm0, %v647_v39  ;;  %772 = vadd.xlane.f32.xlu0 %v771_v42  ;;  %v1151_v44 = vpop.eup %1150  ;;  %v352_v49 = vmul.f32 %v1149_v43, %v351_v48 }
 0x424   : > { %362 = vperm.xlu1 %1138, %v1149_v43   ;;  %1094 = vmatpush3.bf16.msra.mxu0 %v791_v40  ;;  %v1153_v47 = vpop.eup %1152  ;;  %v633_v63 = vmul.f32 %v1151_v44, %v632_v60 }
 0x425   : > { %1095 = vmatprep.mubr.msk.bf16.mxu0 %vm1189_vm1, %v1188_v0  ;;  %v1155_v51 = vpop.eup %1154  ;;  %v770_v5 = vmul.f32 %v1153_v47, %v769_v4 }
 0x426   : > { %v496_v55 = vmul.f32 %v1155_v51, %v495_v54 }
 0x428   : > { %643 = vperm.xlu1 %1138, %v1151_v44  }
 0x42b   : > { %1096 = vmatmul.mubr.msk.bf16.vlgmr.msra.gmra.mrb[12].mxu0 %vm271_vm0, %v784_v45 }
 0x42c   : > { %780 = vperm.xlu1 %1138, %v1153_v47  }
 0x437   : > { %v355_v50 = vpop.xlane.xlu0 %354 }
 0x438   : > { %v356_v52 = vadd.f32 %v355_v50, %v352_v49 }
 0x439   : > { %506 = vperm.xlu0 %1137, %v1155_v51  }
 0x43a   : > { %358 = vst.msk [vmem:[#allocation3] sm:$0xff] %vm262_vm2, %v356_v52 }
 0x441   : > { %v840_v0 = vld [vmem:[#allocation3] sm:$0xff] }
 0x442   : > { %1156 = vrcp.f32 %v840_v0 }
 0x44c   : > { %v1157_v53 = vpop.eup %1156 }
 0x44d   : > { %844 = vperm.xlu0 %1137, %v1157_v53  }
 0x4a0   : > { %v499_v56 = vpop.xlane.xlu1 %498 }
 0x4a1   : > { %v500_v57 = vadd.f32 %v499_v56, %v496_v55 }
 0x4a3   : > { %501 = vst.msk [vmem:[#allocation3 + $0x8] sm:$0xff] %vm262_vm2, %v500_v57 }
 0x4a4   : > { %v363_v59 = vpop.permute.xlu1 %362 }
 0x4a5   : > { %v365_v61 = vmul.f32 %v363_v59, %v359_v58 }
 0x4a7   : > { %v419_v62 = vadd.f32 %v1327_v41, %v365_v61 }
 0x4a8   : > { %v636_v1 = vpop.xlane.xlu0 %635  ;;  %v644_v29 = vpop.permute.xlu1 %643 }
 0x4a9   : > { %420 = vst.msk [vmem:[#allocation4] sm:$0xff] %vm271_vm0, %v419_v62  ;;  %v637_v2 = vadd.f32 %v636_v1, %v633_v63  ;;  %v646_v19 = vmul.f32 %v644_v29, %v640_v28 }
 0x4aa   : > { %v852_v3 = vld [vmem:[#allocation3 + $0x8] sm:$0xff] }
 0x4ab   : > { %638 = vst.msk [vmem:[#allocation3 + $0x10] sm:$0xff] %vm262_vm2, %v637_v2  ;;  %1158 = vrcp.f32 %v852_v3 }
 0x4ac   : > { %v781_v36 = vpop.permute.xlu1 %780 }
 0x4ad   : > { %v783_v37 = vmul.f32 %v781_v36, %v777_v35 }
 0x4b0   : > { %v773_v6 = vpop.xlane.xlu0 %772  ;;  %v839_v13 = vld [vmem:[#allocation4] sm:$0xff] }
 0x4b1   : > { %v774_v7 = vadd.f32 %v773_v6, %v770_v5 }
 0x4b2   : > { %v870_v8 = vld [vmem:[#allocation3 + $0x10] sm:$0xff] }
 0x4b3   : > { %775 = vst.msk [vmem:[#allocation3 + $0x18] sm:$0xff] %vm262_vm2, %v774_v7  ;;  %1160 = vrcp.f32 %v870_v8 }
 0x4b5   : > { %v1159_v9 = vpop.eup %1158 }
 0x4b6   : > { %856 = vperm.xlu1 %1138, %v1159_v9  }
 0x4b8   : > { %v507_v12 = vpop.permute.xlu0 %506 }
 0x4b9   : > { %v509_v18 = vmul.f32 %v507_v12, %v503_v17 }
 0x4ba   : > { %v888_v41 = vld [vmem:[#allocation3 + $0x18] sm:$0xff] }
 0x4bb   : > { %1162 = vrcp.f32 %v888_v41 }
 0x4bd   : > { %v1161_v10 = vpop.eup %1160 }
 0x4be   : > { %874 = vperm.xlu1 %1138, %v1161_v10  }
 0x4c5   : > { %v1163_v11 = vpop.eup %1162 }
 0x4c6   : > { %892 = vperm.xlu1 %1138, %v1163_v11  }
 0x4cc   : > { %v845_v14 = vpop.permute.xlu0 %844 }
 0x4cd   : > { %v847_v15 = vmul.f32 %v845_v14, %v839_v13 }
 0x4cf   : > { %v848_v16 = vpack.c.bf16 %v847_v15, %v847_v15 }
 0x4d1   : > { %850 = vst.msk [vmem:[%s1386_s8] sm:$0xf] %vm849_vm6, %v848_v16 }
 0x4ee   : > { %v553_v20 = vpop.f32.mrb[4].mxu0 }
 0x4ef   : > { %v559_v22 = vadd.f32 %v553_v20, %v509_v18  ;;  %v1073_v25 = vpop.f32.mrb[5].mxu0 }
 0x4f0   : > { %v556_v26 = vpop.f32.mrb[6].mxu0 }
 0x4f1   : > { %560 = vst.msk [vmem:[#allocation4 + $0x8] sm:$0xff] %vm271_vm0, %v559_v22  ;;  %v1074_v27 = vpop.f32.mrb[7].mxu0 }
 0x4f6   : > { %v690_v30 = vpop.f32.mrb[8].mxu0 }
 0x4f7   : > { %v696_v31 = vadd.f32 %v690_v30, %v646_v19  ;;  %v1085_v32 = vpop.f32.mrb[9].mxu0 }
 0x4f8   : > { %v693_v33 = vpop.f32.mrb[10].mxu0  ;;  %v851_v42 = vld [vmem:[#allocation4 + $0x8] sm:$0xff] }
 0x4f9   : > { %697 = vst.msk [vmem:[#allocation4 + $0x10] sm:$0xff] %vm271_vm0, %v696_v31  ;;  %v1086_v34 = vpop.f32.mrb[11].mxu0 }
 0x4fe   : > { %v827_v21 = vpop.f32.mrb[12].mxu0 }
 0x4ff   : > { %v833_v23 = vadd.f32 %v827_v21, %v783_v37  ;;  %v1097_v24 = vpop.f32.mrb[13].mxu0 }
 0x500   : > { %v830_v38 = vpop.f32.mrb[14].mxu0  ;;  %v869_v46 = vld [vmem:[#allocation4 + $0x10] sm:$0xff] }
 0x501   : > { %834 = vst.msk [vmem:[#allocation4 + $0x18] sm:$0xff] %vm271_vm0, %v833_v23  ;;  %v1098_v39 = vpop.f32.mrb[15].mxu0 }
 0x508   : > { %v887_v50 = vld [vmem:[#allocation4 + $0x18] sm:$0xff] }
 0x535   : > { %v857_v40 = vpop.permute.xlu1 %856 }
 0x536   : > { %v859_v43 = vmul.f32 %v857_v40, %v851_v42 }
 0x538   : > { %v1032_v44 = vpack.c.bf16 %v859_v43, %v859_v43 }
 0x53a   : > { %864 = vrot.lane.b32.xlu0 %v1032_v44, %s1199_s9 }
 0x53d   : > { %v875_v45 = vpop.permute.xlu1 %874 }
 0x53e   : > { %v877_v47 = vmul.f32 %v875_v45, %v869_v46 }
 0x540   : > { %v1033_v48 = vpack.c.bf16 %v877_v47, %v877_v47 }
 0x542   : > { %882 = vrot.lane.b32.xlu0 %v1033_v48, %s1200_s10 }
 0x545   : > { %v893_v49 = vpop.permute.xlu1 %892 }
 0x546   : > { %v895_v51 = vmul.f32 %v893_v49, %v887_v50 }
 0x548   : > { %v1034_v52 = vpack.c.bf16 %v895_v51, %v895_v51 }
 0x54a   : > { %900 = vrot.lane.b32.xlu0 %v1034_v52, %s1201_s11 }
 0x5ac   : > { %v865_v0 = vpop.permute.xlu0 %864 }
 0x5ad   : > { %868 = vst.msk [vmem:[%s1386_s8] sm:$0xf] %vm867_vm7, %v865_v0 }
 0x5b4   : > { %v883_v53 = vpop.permute.xlu0 %882 }
 0x5b5   : > { %886 = vst.msk [vmem:[%s1386_s8] sm:$0xf] %vm885_vm8, %v883_v53 }
 0x5bc   : > { %v901_v54 = vpop.permute.xlu0 %900 }
 0x5bd   : > { %904 = vst.msk [vmem:[%s1386_s8] sm:$0xf] %vm903_vm9, %v901_v54 }
 0x5be PF: > { %s13_s14 = sadd.s32 1, %s1186_s14   ;;  %s1408_s12 = smov %s1182_s13 }
 0x5bf   : > { %p10_p5 = scmp.ge.s32.totalorder %s13_s14, 4   ;;  %s1409_s13 = smov %s1411_s15 }
 0x5c1   :  { %12 = sbr.rel (!%p10_p5) target bundleno = 2 (0x2), region = 85 }

// kernel: bert_forward.27
= control target key start
LH: loop header
LB: loop body
LE: loop exit
PB: predicated region body
PF: predicated region fallthrough
CT: control target
= control target key end

     0   :  { %v363_v1 = vmov 0.0   ;;  %vm364_vm0 = vmmov 0   ;;  %vm29_vm1 = vcmask 261120   ;;  %s467_s0 = inlined_call_operand.vmem [shape: bf16[16,32], index: 0, kind: input, shape index: {}]   ;;  %s468_s1 = inlined_call_operand.vmem [shape: bf16[32,128], index: 1, kind: input, shape index: {}]   ;;  %s469_s2 = inlined_call_operand.vmem [shape: f32[1,128], index: 2, kind: input, shape index: {}]   ;;  %s470_s3 = inlined_call_operand.vmem [shape: bf16[128,32], index: 3, kind: input, shape index: {}]   ;;  %s471_s4 = inlined_call_operand.vmem [shape: f32[1,32], index: 4, kind: input, shape index: {}]   ;;  %s472_s5 = inlined_call_operand.vmem [shape: f32[16,32], index: 5, kind: input, shape index: {}]   ;;  %s473_s6 = inlined_call_operand.hbm [shape: f32[16,32], index: 6, kind: output, shape index: {}]  }
   0x1   :  { %v324_v0 = vld [vmem:[%s468_s1] sm:$0xff]   ;;  %291 = vmatprep.subr.bf16.mxu0 %v363_v1  ;;  %299 = vmatprep.subr.bf16.mxu1 %v363_v1  ;;  %v325_v2 = vld [vmem:[%s468_s1 + $0x8] sm:$0xff]   ;;  %30 = vst.msk [vmem:[#allocation2] sm:$0xff] %vm29_vm1, %v363_v1  ;;  %31 = vst.msk [vmem:[#allocation2 + $0x8] sm:$0xff] %vm29_vm1, %v363_v1 }
   0x2   :  { %292 = vmatpush3.bf16.msra.mxu0 %v324_v0  ;;  %295 = vmatprep.mubr.msk.bf16.mxu0 %vm364_vm0, %v363_v1  ;;  %v327_v3 = vld [vmem:[%s470_s3] sm:$0xff]   ;;  %v328_v5 = vld [vmem:[%s470_s3 + $0x8] sm:$0xff]  }
   0x3   :  { %293 = vmatprep.subr.bf16.mxu0 %v363_v1  ;;  %315 = vmatprep.mubr.msk.bf16.mxu1 %vm364_vm0, %v363_v1  ;;  %v326_v4 = vld [vmem:[%s467_s0] sm:$0xff]  }
   0x4   :  { %300 = vmatpush3.bf16.msra.mxu1 %v327_v3 }
   0x5   :  { %301 = vmatprep.subr.bf16.mxu1 %v363_v1 }
   0x6   :  { %294 = vmatpush3.bf16.msra.mxu0 %v325_v2 }
   0x8   :  { %302 = vmatpush3.bf16.msra.mxu1 %v328_v5 }
   0x9   :  { %296 = vmatmul.mubr.msk.bf16.vlgmr.msra.gmra.mrb[0].mxu0 %vm29_vm1, %v326_v4 }
   0xa   :  { %11 = vsyncpa [#allocation4], 0  ;;  %303 = vmatprep.subr.bf16.mxu1 %v363_v1  ;;  %v329_v6 = vld [vmem:[%s470_s3 + $0x10] sm:$0xff]   ;;  %v330_v7 = vld [vmem:[%s470_s3 + $0x18] sm:$0xff]   ;;  %s365_s21 = smov [#allocation3]  }
   0xb   :  { %v331_v8 = vld [vmem:[%s470_s3 + $0x20] sm:$0xff]   ;;  %v332_v9 = vld [vmem:[%s470_s3 + $0x28] sm:$0xff]   ;;  %v333_v10 = vld [vmem:[%s470_s3 + $0x30] sm:$0xff]   ;;  %s254_s22 = sshll.u32 %s365_s21, 4  ;;  %s255_s22 = int_to_ptr.vmem [resolvable:$true] %s254_s22 }
   0xc   :  { %304 = vmatpush3.bf16.msra.mxu1 %v329_v6  ;;  %v334_v11 = vld [vmem:[%s470_s3 + $0x38] sm:$0xff]   ;;  %v265_v12 = vld [vmem:[%s469_s2] ss:$0 sm:$0xff]  ;;  %v118_v32 = vld [vmem:[#allocation2 + $0x8] sm:$0xff]  ;;  %p344_p1 = scmp.lt.s32.totalorder %s255_s22, %s255_s22 }
   0xd   :  { %305 = vmatprep.subr.bf16.mxu1 %v363_v1  ;;  %v117_v30 = vld [vmem:[#allocation2] sm:$0xff]  ;;  %v244_v43 = vld [vmem:[%s472_s5 + $0x8] sm:$0xff] }
   0xe   :  { %v278_v38 = vld [vmem:[%s471_s4] ss:$0 sm:$0xff]  ;;  %s339_s4 = scalar_lea.vmem %s255_s22, 256 }
   0xf   :  { %v243_v40 = vld [vmem:[%s472_s5] sm:$0xff]  ;;  %p340_p0 = scmp.ne.s32.totalorder %s255_s22, %s339_s4  ;;  %p345_p2 = scmp.lt.s32.totalorder %s339_s4, %s339_s4 }
  0x10   :  { %306 = vmatpush3.bf16.msra.mxu1 %v330_v7 }
  0x11   :  { %307 = vmatprep.subr.bf16.mxu1 %v363_v1  ;;  %p346_p3 = por %p345_p2, %p344_p1 }
  0x13   :  { %p347_p4 = pnand %p346_p3, %p340_p0 }
  0x14   :  { %308 = vmatpush3.bf16.msra.mxu1 %v331_v8 }
  0x15   :  { %309 = vmatprep.subr.bf16.mxu1 %v363_v1 }
  0x18   :  { %310 = vmatpush3.bf16.msra.mxu1 %v332_v9 }
  0x19   :  { %311 = vmatprep.subr.bf16.mxu1 %v363_v1 }
  0x1c   :  { %312 = vmatpush3.bf16.msra.mxu1 %v333_v10 }
  0x1d   :  { %313 = vmatprep.subr.bf16.mxu1 %v363_v1 }
  0x20   :  { %314 = vmatpush3.bf16.msra.mxu1 %v334_v11 }
  0xdc   :  { %v100_v13 = vpop.f32.mrb[0].mxu0 }
  0xdd   :  { %v101_v14 = vadd.f32 %v265_v12, %v100_v13  ;;  %v297_v15 = vpop.f32.mrb[1].mxu0 }
  0xde   :  { %v103_v16 = vpop.f32.mrb[2].mxu0 }
  0xdf   :  { %v109_v17 = vmul.f32 0.70710677, %v101_v14  ;;  %v104_v18 = vadd.f32 %v265_v12, %v103_v16  ;;  %v298_v19 = vpop.f32.mrb[3].mxu0  ;;  %v107_v24 = vmul.f32 0.5, %v101_v14 }
  0xe1   :  { %335 = verf.f32 %v109_v17  ;;  %v110_v20 = vmul.f32 0.70710677, %v104_v18  ;;  %v108_v25 = vmul.f32 0.5, %v104_v18 }
  0xe3   :  { %337 = verf.f32 %v110_v20 }
  0xeb   :  { %v336_v21 = vpop.eup %335 }
  0xec   :  { %v113_v22 = vadd.f32 1.0, %v336_v21 }
  0xed   :  { %v338_v23 = vpop.eup %337 }
  0xee   :  { %v114_v26 = vadd.f32 1.0, %v338_v23  ;;  %v115_v27 = vmul.f32 %v113_v22, %v107_v24 }
  0xf0   :  { %v116_v28 = vmul.f32 %v114_v26, %v108_v25 }
  0xf2   :  { %v119_v29 = vpack.c.bf16 %v116_v28, %v115_v27 }
  0xf4   :  { %316 = vmatmul.mubr.bf16.vlgmr.msra.gmra.mrb[0].mxu1 %v119_v29 }
 0x1c7   :  { %v218_v31 = vpop.f32.mrb[0].mxu1 }
 0x1c8   :  { %v225_v33 = vadd.f32 %v218_v31, %v117_v30  ;;  %v317_v34 = vpop.f32.mrb[1].mxu1 }
 0x1c9   :  { %v221_v35 = vpop.f32.mrb[2].mxu1 }
 0x1ca   :  { %227 = vst.msk [vmem:[#allocation2] sm:$0xff] %vm29_vm1, %v225_v33  ;;  %v226_v36 = vadd.f32 %v221_v35, %v118_v32  ;;  %v318_v37 = vpop.f32.mrb[3].mxu1 }
 0x1cc   :  { %228 = vst.msk [vmem:[#allocation2 + $0x8] sm:$0xff] %vm29_vm1, %v226_v36 }
 0x1d1   :  { %v232_v39 = vld [vmem:[#allocation2] sm:$0xff] }
 0x1d2   :  { %v241_v41 = vadd.f32 %v278_v38, %v232_v39 }
 0x1d3   :  { %v233_v42 = vld [vmem:[#allocation2 + $0x8] sm:$0xff] }
 0x1d4   :  { %v242_v44 = vadd.f32 %v278_v38, %v233_v42  ;;  %v245_v45 = vadd.f32 %v243_v40, %v241_v41 }
 0x1d6   :  { %v246_v46 = vadd.f32 %v244_v43, %v242_v44  ;;  %247 = vst.msk [vmem:[#allocation3] sm:$0xff] %vm29_vm1, %v245_v45 }
 0x1d8   :  { %248 = vst.msk [vmem:[#allocation3 + $0x8] sm:$0xff] %vm29_vm1, %v246_v46 }
 0x1d9   :  { %350 = shalt.err (!%p347_p4)
}
 0x1da   :  { %s351_s27 = scalar_lea.hbm %s473_s6, 256 }
 0x1db   :  { %p352_p5 = scmp.ne.s32.totalorder %s473_s6, %s351_s27  ;;  %p355_p6 = scmp.lt.u32.totalorder %s351_s27, %s473_s6 }
 0x1dd   :  { %p357_p7 = pnand %p355_p6, %p352_p5 }
 0x1df   :  { %360 = shalt.err (!%p357_p7)
}
 0x1e0   :  { %s366_s30 = smov 128   ;;  %s367_s7 = smov 8  }
 0x1e1   :  { %260 = dma.vmem_to_hbm [thread:$0]  %s255_s22, 256, %s473_s6, [#allocation4], %s366_s30, %s366_s30, %s367_s7  }
 0x1e2   :  { %361 = dma.done.wait [#allocation4], 256  }
 0x1e3   :  { %362 = vsyncadd [#allocation4], 4294967040 }
 0x1e4   :  { %264 = vsyncpa [#allocation4], 1 }

</bundles_post_ra>
